<compile_context>
chip_gen: v7x
topology: tpu7x:2x2x1
jax: 0.10.0
libtpu: 0.0.40
codegen_flags: <defaults>
</compile_context>

<pallas_src>
import jax
import jax.numpy as jnp
from jax.experimental import pallas as pl
from jax.experimental.pallas import tpu as pltpu


def _round_up(x, m):
    return ((x + m - 1) // m) * m


def attention_gating_kernel(shared_ref, task_ref, w1_ref, b1_ref, w2_ref,
                            b2_ref, out_ref):
    shared = shared_ref[...]
    task = task_ref[...]

    # Linear(D -> H) + ReLU. Operands in the weight dtype (f32, or bf16 if the
    # wrapper pre-cast the weights), f32 accumulation on the MXU.
    h = jnp.dot(shared.astype(w1_ref.dtype), w1_ref[...],
                preferred_element_type=jnp.float32)
    h = jnp.maximum(h + b1_ref[...], 0.0)          # b1 is (1, H), broadcasts

    # Linear(H -> D) + Sigmoid; cast h to the weight dtype for the MXU fast path.
    logits = jnp.dot(h.astype(w2_ref.dtype), w2_ref[...],
                     preferred_element_type=jnp.float32)
    z = logits + b2_ref[...]                        # b2 is (1, D)
    # sigmoid(z) = 1 / (1 + exp(-z)): exp on the EUP, exact reciprocal keeps
    # the tight tolerance (approx=True would relax it), both off the VALU slot.
    attn = pl.reciprocal(1.0 + jnp.exp(-z))

    # Gate: task + attn * (shared - task)  ==  shared*attn + task*(1-attn)
    shared_f = shared.astype(jnp.float32)
    task_f = task.astype(jnp.float32)
    out_ref[...] = (task_f + attn * (shared_f - task_f)).astype(out_ref.dtype)


def attention_gating(shared, task, w1, b1, w2, b2, *, tb=512,
                     matmul_dtype=None, interpret=False):
    """shared, task: [B, D]; w1: [D, H]; b1: [H]; w2: [H, D]; b2: [D].

    Weights are stored [in, out] (transpose of torch nn.Linear's [out, in]).
    matmul_dtype: optionally pre-cast W1/W2 (and hence MXU operands) to e.g.
    jnp.bfloat16; accumulation stays f32.
    """
    B, D = shared.shape
    H = w1.shape[1]

    if matmul_dtype is not None:
        w1 = w1.astype(matmul_dtype)
        w2 = w2.astype(matmul_dtype)

    # Biases stay f32 (added post-accumulation) and 2D so they tile cleanly.
    b1_2d = b1.astype(jnp.float32).reshape(1, H)
    b2_2d = b2.astype(jnp.float32).reshape(1, D)

    # Batch tile: as large as requested, but keep >= 2 grid steps so v7x's two
    # TensorCores both get work on the parallel axis, and keep the sublane dim
    # a multiple of 8 (or == B when B is tiny).
    tb = min(tb, B)
    if B > 8:
        tb = min(tb, _round_up(pl.cdiv(B, 2), 8))
    grid = (pl.cdiv(B, tb),)

    # Explicit VMEM budget: 3 streamed (tb, D) arrays double-buffered +
    # single-buffered resident weights/biases + scratch margin.
    act_itemsize = jnp.dtype(shared.dtype).itemsize
    w_itemsize = jnp.dtype(w1.dtype).itemsize
    stream_bytes = 3 * 2 * tb * D * act_itemsize
    weight_bytes = (D * H + H * D) * w_itemsize + (H + D) * 4
    vmem_limit = int(min(max(stream_bytes + weight_bytes + (8 << 20), 32 << 20),
                         64 << 20))

    cost = pl.CostEstimate(
        flops=4 * B * D * H + 6 * B * D,
        transcendentals=B * D,
        bytes_accessed=3 * B * D * act_itemsize + weight_bytes,
    )

    resident = dict(pipeline_mode=pl.Buffered(1))  # constant index_map, keep 1 buffer
    return pl.pallas_call(
        attention_gating_kernel,
        out_shape=jax.ShapeDtypeStruct((B, D), shared.dtype),
        grid_spec=pl.GridSpec(
            grid=grid,
            in_specs=[
                pl.BlockSpec((tb, D), lambda i: (i, 0)),              # shared (streamed)
                pl.BlockSpec((tb, D), lambda i: (i, 0)),              # task   (streamed)
                pl.BlockSpec((D, H), lambda i: (0, 0), **resident),   # w1     (resident)
                pl.BlockSpec((1, H), lambda i: (0, 0), **resident),   # b1     (resident)
                pl.BlockSpec((H, D), lambda i: (0, 0), **resident),   # w2     (resident)
                pl.BlockSpec((1, D), lambda i: (0, 0), **resident),   # b2     (resident)
            ],
            out_specs=pl.BlockSpec((tb, D), lambda i: (i, 0)),
        ),
        compiler_params=pltpu.CompilerParams(
            dimension_semantics=("parallel",),
            vmem_limit_bytes=vmem_limit),
        cost_estimate=cost,
        interpret=interpret,
    )(shared, task, w1, b1_2d, w2, b2_2d)


def reference(shared, task, w1, b1, w2, b2):
    h = jnp.maximum(shared @ w1 + b1, 0.0)
    attn = jax.nn.sigmoid(h @ w2 + b2)
    return shared * attn + task * (1.0 - attn)


if __name__ == "__main__":
    key = jax.random.PRNGKey(0)
    # Lane-dense feature dims (multiples of 128); batch big enough that the
    # auto-capped tile is 256 rows with a 2-step parallel grid.
    B, D = 512, 256
    H = D // 2

    k_s, k_t, k_w1, k_b1, k_w2, k_b2 = jax.random.split(key, 6)
    shared = jax.random.normal(k_s, (B, D), dtype=jnp.float32)
    task = jax.random.normal(k_t, (B, D), dtype=jnp.float32)

    # Parameters for nn.Linear(D, D//2) / nn.Linear(D//2, D), stored [in, out].
    w1 = jax.random.normal(k_w1, (D, H), dtype=jnp.float32) * 0.1
    b1 = jax.random.normal(k_b1, (H,), dtype=jnp.float32) * 0.1
    w2 = jax.random.normal(k_w2, (H, D), dtype=jnp.float32) * 0.1
    b2 = jax.random.normal(k_b2, (D,), dtype=jnp.float32) * 0.1

    out = attention_gating(shared, task, w1, b1, w2, b2)
    out = jax.block_until_ready(out)

    ref = reference(shared, task, w1, b1, w2, b2)
    assert out.shape == (B, D)
    assert jnp.allclose(out, ref, atol=1e-4, rtol=1e-4), "mismatch vs reference"

    print("KERNEL_OK")
</pallas_src>

<mosaic_0001>
module attributes {stable_mosaic.version = 11 : i64} {
  func.func @attention_gating_kernel(%arg0: i32, %arg1: memref<256x256xf32, #tpu.memory_space<vmem>>, %arg2: memref<256x256xf32, #tpu.memory_space<vmem>>, %arg3: memref<256x128xf32, #tpu.memory_space<vmem>>, %arg4: memref<1x128xf32, #tpu.memory_space<vmem>>, %arg5: memref<128x256xf32, #tpu.memory_space<vmem>>, %arg6: memref<1x256xf32, #tpu.memory_space<vmem>>, %arg7: memref<256x256xf32, #tpu.memory_space<vmem>>) attributes {dimension_semantics = [#tpu.dimension_semantics<parallel>], iteration_bounds = array<i64: 2>, scalar_prefetch = 0 : i64, scratch_operands = 0 : i64, tpu.core_type = #tpu.core_type<tc>, window_params = [{transform_indices = @transform_0, window_bounds = array<i64: 256, 256>}, {transform_indices = @transform_1, window_bounds = array<i64: 256, 256>}, {pipeline_mode = #tpu.pipeline_mode<synchronous>, transform_indices = @transform_2, window_bounds = array<i64: 256, 128>}, {pipeline_mode = #tpu.pipeline_mode<synchronous>, transform_indices = @transform_3, window_bounds = array<i64: 1, 128>}, {pipeline_mode = #tpu.pipeline_mode<synchronous>, transform_indices = @transform_4, window_bounds = array<i64: 128, 256>}, {pipeline_mode = #tpu.pipeline_mode<synchronous>, transform_indices = @transform_5, window_bounds = array<i64: 1, 256>}, {transform_indices = @transform_6, window_bounds = array<i64: 256, 256>}]} {
    %c0 = arith.constant 0 : index
    %c0_0 = arith.constant 0 : index
    %0 = vector.load %arg1[%c0, %c0_0] : memref<256x256xf32, #tpu.memory_space<vmem>>, vector<256x256xf32>
    %c0_1 = arith.constant 0 : index
    %c0_2 = arith.constant 0 : index
    %1 = vector.load %arg2[%c0_1, %c0_2] : memref<256x256xf32, #tpu.memory_space<vmem>>, vector<256x256xf32>
    %c0_3 = arith.constant 0 : index
    %c0_4 = arith.constant 0 : index
    %2 = vector.load %arg3[%c0_3, %c0_4] : memref<256x128xf32, #tpu.memory_space<vmem>>, vector<256x128xf32>
    %cst = arith.constant dense<0.000000e+00> : vector<256x128xf32>
    %3 = tpu.matmul %0, %2, %cst {dimension_numbers = #tpu.dot_dimension_numbers<[1], [0], [0], [1], [0, 0, 1, 1], [], []>} : vector<256x256xf32>, vector<256x128xf32>, vector<256x128xf32> -> vector<256x128xf32>
    %c0_5 = arith.constant 0 : index
    %c0_6 = arith.constant 0 : index
    %4 = vector.load %arg4[%c0_5, %c0_6] : memref<1x128xf32, #tpu.memory_space<vmem>>, vector<1x128xf32>
    %5 = vector.broadcast %4 : vector<1x128xf32> to vector<256x128xf32>
    %6 = arith.addf %3, %5 : vector<256x128xf32>
    %cst_7 = arith.constant 0.000000e+00 : f32
    %7 = vector.broadcast %cst_7 : f32 to vector<256x128xf32>
    %8 = arith.maximumf %6, %7 : vector<256x128xf32>
    %c0_8 = arith.constant 0 : index
    %c0_9 = arith.constant 0 : index
    %9 = vector.load %arg5[%c0_8, %c0_9] : memref<128x256xf32, #tpu.memory_space<vmem>>, vector<128x256xf32>
    %cst_10 = arith.constant dense<0.000000e+00> : vector<256x256xf32>
    %10 = tpu.matmul %8, %9, %cst_10 {dimension_numbers = #tpu.dot_dimension_numbers<[1], [0], [0], [1], [0, 0, 1, 1], [], []>} : vector<256x128xf32>, vector<128x256xf32>, vector<256x256xf32> -> vector<256x256xf32>
    %c0_11 = arith.constant 0 : index
    %c0_12 = arith.constant 0 : index
    %11 = vector.load %arg6[%c0_11, %c0_12] : memref<1x256xf32, #tpu.memory_space<vmem>>, vector<1x256xf32>
    %12 = vector.broadcast %11 : vector<1x256xf32> to vector<256x256xf32>
    %13 = arith.addf %10, %12 : vector<256x256xf32>
    %cst_13 = arith.constant 0.000000e+00 : f32
    %14 = vector.broadcast %cst_13 : f32 to vector<256x256xf32>
    %15 = arith.subf %14, %13 : vector<256x256xf32>
    %16 = math.exp %15 : vector<256x256xf32>
    %cst_14 = arith.constant 1.000000e+00 : f32
    %17 = vector.broadcast %cst_14 : f32 to vector<256x256xf32>
    %18 = arith.addf %17, %16 : vector<256x256xf32>
    %19 = tpu.reciprocal %18 : vector<256x256xf32> -> vector<256x256xf32>
    %20 = arith.subf %0, %1 : vector<256x256xf32>
    %21 = arith.mulf %19, %20 : vector<256x256xf32>
    %22 = arith.addf %1, %21 : vector<256x256xf32>
    %c0_15 = arith.constant 0 : index
    %c0_16 = arith.constant 0 : index
    %23 = vector.load %arg7[%c0_15, %c0_16] : memref<256x256xf32, #tpu.memory_space<vmem>>, vector<256x256xf32>
    tpu.vector_store %arg7[%c0_15, %c0_16], %22 {strides = array<i32>} : memref<256x256xf32, #tpu.memory_space<vmem>>, vector<256x256xf32>,
    return
  }
  func.func @transform_0(%arg0: i32) -> (i32, i32) {
    %c0_i32 = arith.constant 0 : i32
    %c0_i32_0 = arith.constant 0 : i32
    return %arg0, %c0_i32 : i32, i32
  }
  func.func @transform_1(%arg0: i32) -> (i32, i32) {
    %c0_i32 = arith.constant 0 : i32
    %c0_i32_0 = arith.constant 0 : i32
    return %arg0, %c0_i32 : i32, i32
  }
  func.func @transform_2(%arg0: i32) -> (i32, i32) {
    %c0_i32 = arith.constant 0 : i32
    %c0_i32_0 = arith.constant 0 : i32
    %c0_i32_1 = arith.constant 0 : i32
    return %c0_i32, %c0_i32_0 : i32, i32
  }
  func.func @transform_3(%arg0: i32) -> (i32, i32) {
    %c0_i32 = arith.constant 0 : i32
    %c0_i32_0 = arith.constant 0 : i32
    %c0_i32_1 = arith.constant 0 : i32
    return %c0_i32, %c0_i32_0 : i32, i32
  }
  func.func @transform_4(%arg0: i32) -> (i32, i32) {
    %c0_i32 = arith.constant 0 : i32
    %c0_i32_0 = arith.constant 0 : i32
    %c0_i32_1 = arith.constant 0 : i32
    return %c0_i32, %c0_i32_0 : i32, i32
  }
  func.func @transform_5(%arg0: i32) -> (i32, i32) {
    %c0_i32 = arith.constant 0 : i32
    %c0_i32_0 = arith.constant 0 : i32
    %c0_i32_1 = arith.constant 0 : i32
    return %c0_i32, %c0_i32_0 : i32, i32
  }
  func.func @transform_6(%arg0: i32) -> (i32, i32) {
    %c0_i32 = arith.constant 0 : i32
    %c0_i32_0 = arith.constant 0 : i32
    return %arg0, %c0_i32 : i32, i32
  }
}

</mosaic_0001>

<bundles_post_ra>
// kernel: tpu_custom_call.1
= control target key start
LH: loop header
LB: loop body
LE: loop exit
PB: predicated region body
PF: predicated region fallthrough
CT: control target
= control target key end

     0   :  { %s3719_s0 = inlined_call_operand.hbm [shape: f32[512,256], index: 0, kind: input, shape index: {}]   ;;  %s3720_s1 = inlined_call_operand.hbm [shape: f32[512,256], index: 1, kind: input, shape index: {}]   ;;  %s3721_s2 = inlined_call_operand.hbm [shape: f32[256,128], index: 2, kind: input, shape index: {}]   ;;  %s3722_s3 = inlined_call_operand.vmem [shape: f32[1,128], index: 3, kind: input, shape index: {}]   ;;  %s3723_s4 = inlined_call_operand.hbm [shape: f32[128,256], index: 4, kind: input, shape index: {}]   ;;  %s3724_s5 = inlined_call_operand.vmem [shape: f32[1,256], index: 5, kind: input, shape index: {}]   ;;  %s3725_s6 = inlined_call_operand.hbm [shape: f32[512,256], index: 6, kind: output, shape index: {}]  }
   0x1   :  { %3810 = sst [smem:[#allocation68_spill]] %s3719_s0 }
   0x2   :  { %3811 = sst [smem:[#allocation69_spill]] %s3721_s2 }
   0x3   :  { %3812 = sst [smem:[#allocation70_spill]] %s3723_s4 }
   0x4   :  { %11 = vsyncpa [#allocation3], 0 }
   0x5   :  { %13 = vsyncpa [#allocation3 + $0x1], 0 }
   0x6   :  { %14 = vsyncpa [#allocation6], 0 }
   0x7   :  { %16 = vsyncpa [#allocation6 + $0x1], 0 }
   0x8   :  { %17 = vsyncpa [#allocation9], 0 }
   0x9   :  { %18 = vsyncpa [#allocation4], 0 }
   0xa   :  { %20 = vsyncpa [#allocation4 + $0x1], 0  ;;  %s2496_s21 = smov 0   ;;  %s2498_s22 = smov 0  }
   0xb   :  { %s2500_s23 = smov 0   ;;  %s2502_s24 = smov 0  }
   0xc LB: > { %s2517_s25 = sadd.s32 4294967295, %s2446_s24   ;;  %s1775_s26 = sadd.s32 4294967294, %s2446_s24   ;;  %s2446_s24 = sphi %s2502_s24, %s3987_s24   ;;  %s2442_s23 = sphi %s2500_s23, %s3986_s23   ;;  %s2438_s22 = sphi %s2498_s22, %s3985_s22   ;;  %s2434_s21 = sphi %s2496_s21, %s3984_s21  }
   0xd   : > { %p46_p0 = scmp.ne.s32.totalorder %s2438_s22, %s2434_s21  ;;  %p3726_p1 = scmp.eq.s32.totalorder %s2517_s25, 0 }
   0xe   : > { %p186_p3 = scmp.eq.s32.totalorder %s1775_s26, 1  ;;  %p1776_p5 = scmp.ge.s32.totalorder %s2446_s24, 1 }
   0xf   : > { %p2526_p4 = por %p3726_p1, %p46_p0  ;;  %p193_p7 = scmp.lt.s32.totalorder %s2446_s24, 3 }
  0x10   : > { %p2531_p6 = por %p186_p3, %p46_p0  ;;  %s2448_s30 = smov [#allocation7]  }
  0x11   : > { %s3813_s27 = scalar_select %p2526_p4, 1, 0 }
  0x12   : > { %s3814_s28 = scalar_select %p2531_p6, 1, 0 }
  0x13   : > { %p2536_p8 = pnand %p1776_p5, %p193_p7  ;;  %s205_s7 = sshll.u32 %s2448_s30, 4  ;;  %s2540_s7 = int_to_ptr.vmem [resolvable:$true] %s205_s7 }
  0x14   : > { %s2449_s9 = smov [#allocation8]   ;;  %s3817_s2 = sld [smem:[#allocation69_spill]] }
  0x15   : > { %p1901_p9 = pneg %p2536_p8  ;;  %s221_s10 = sshll.u32 %s2449_s9, 4  ;;  %s2551_s10 = int_to_ptr.vmem [resolvable:$true] %s221_s10 }
  0x17   : > { %p2547_p11 = pnand %p1901_p9, %p3726_p1 }
  0x19   : > { %p2254_p13 = pneg %p2547_p11 }
  0x1a   : > { %s2252_s13 = scalar_lea.hbm %s3817_s2, 4096 }
  0x1b   : > { %p2253_p12 = scmp.ne.s32.totalorder %s3817_s2, %s2252_s13  ;;  %p2259_p5 = scmp.lt.u32.totalorder %s2252_s13, %s3817_s2 }
  0x1d   : > { %p2255_p0 = pnand %p2254_p13, %p2253_p12 }
  0x1f   : > { %p2256_p3 = pneg %p2255_p0 }
  0x21   : > { %p2261_p7 = pnand %p2259_p5, %p2256_p3 }
  0x23   : > { %2264 = shalt.err (!%p2261_p7)
}
  0x24   : > { %s2265_s18 = scalar_lea.vmem %s2540_s7, 4096  ;;  %p2273_p2 = scmp.lt.s32.totalorder %s2540_s7, %s2540_s7 }
  0x25   : > { %p2266_p9 = scmp.ne.s32.totalorder %s2540_s7, %s2265_s18  ;;  %p2274_p12 = scmp.lt.s32.totalorder %s2265_s18, %s2265_s18 }
  0x27   : > { %p2268_p10 = pnand %p2266_p9, %p2254_p13  ;;  %p2275_p0 = por %p2274_p12, %p2273_p2 }
  0x29   : > { %p2269_p1 = pneg %p2268_p10 }
  0x2b   : > { %p2276_p6 = pnand %p2275_p0, %p2269_p1 }
  0x2d   : > { %2279 = shalt.err (!%p2276_p6)
}
  0x2e   : > { %s2450_s19 = smov 128   ;;  %s2451_s20 = smov 8  }
  0x2f   : > { %1904 = dma.hbm_to_vmem [thread:$0]  (!%p2547_p11), %s3817_s2, 4096, %s2540_s7, [#allocation6], %s2450_s19, %s2450_s19, %s2451_s20  }
  0x30   : > { %s3818_s4 = sld [smem:[#allocation70_spill]] }
  0x36   : > { %s2280_s12 = scalar_lea.hbm %s3818_s4, 4096 }
  0x37   : > { %p2281_p2 = scmp.ne.s32.totalorder %s3818_s4, %s2280_s12  ;;  %p2287_p10 = scmp.lt.u32.totalorder %s2280_s12, %s3818_s4 }
  0x39   : > { %p2283_p1 = pnand %p2281_p2, %p2254_p13 }
  0x3b   : > { %p2284_p6 = pneg %p2283_p1 }
  0x3d   : > { %p2289_p3 = pnand %p2287_p10, %p2284_p6 }
  0x3f   : > { %2292 = shalt.err (!%p2289_p3)
}
  0x40   : > { %s2293_s7 = scalar_lea.vmem %s2551_s10, 4096  ;;  %p2301_p12 = scmp.lt.s32.totalorder %s2551_s10, %s2551_s10 }
  0x41   : > { %p2294_p5 = scmp.ne.s32.totalorder %s2551_s10, %s2293_s7  ;;  %p2302_p0 = scmp.lt.s32.totalorder %s2293_s7, %s2293_s7 }
  0x43   : > { %p2296_p7 = pnand %p2294_p5, %p2254_p13  ;;  %p2303_p2 = por %p2302_p0, %p2301_p12 }
  0x45   : > { %p2297_p9 = pneg %p2296_p7 }
  0x47   : > { %p2304_p1 = pnand %p2303_p2, %p2297_p9 }
  0x49   : > { %2307 = shalt.err (!%p2304_p1)
}
  0x4a   : > { %s3727_s17 = smov 256   ;;  %s3729_s18 = smov 16  }
  0x4b   : > { %1907 = dma.hbm_to_vmem [thread:$0]  (!%p2547_p11), %s3818_s4, 4096, %s2551_s10, [#allocation9], %s3727_s17, %s3727_s17, %s3729_s18  }
  0x4c   : > { %s2609_s26 = sadd.s32 1, %s2446_s24   ;;  %s33_s9 = sadd.s32 1, %s2442_s23 }
  0x4d   : > { %s30_s30 = ssub.s32 %s2446_s24, %s2609_s26  ;;  %p40_p6 = scmp.ne.s32.totalorder %s2442_s23, %s2438_s22 }
  0x4e   : > { %p31_p13 = scmp.eq.s32.totalorder %s30_s30, 0  ;;  %p41_p10 = scmp.eq.s32.totalorder %s2446_s24, 0 }
  0x4f   : > { %p3819_p5 = scmp.eq.s32.totalorder %s2517_s25, 1  ;;  %p1921_p9 = scmp.lt.s32.totalorder %s2446_s24, 2 }
  0x50   : > { %s2618_s11 = scalar_select %p31_p13, %s2442_s23, %s33_s9  }
  0x51   : > { %p42_p3 = por %p41_p10, %p40_p6  ;;  %p2622_p7 = por %p3819_p5, %p40_p6 }
  0x52   : > { %s238_s12 = sand.u32 1, %s2442_s23   ;;  %s1802_s10 = sshll.u32 %s2446_s24, 13 }
  0x53   : > { %s3820_s8 = scalar_select %p2622_p7, 1, 0 }
  0x54   : > { %s1780_s13 = sshll.u32 %s238_s12, 9  ;;  %s3821_s0 = sld [smem:[#allocation68_spill]] }
  0x55   : > { %s242_s7 = scalar_lea.vmem [#allocation2], %s1780_s13  ;;  %p2636_p11 = pnand %p1921_p9, %p42_p3 }
  0x56   : > { %s250_s19 = sshll.u32 %s242_s7, 4  ;;  %s2643_s14 = scalar_lea.hbm %s3720_s1, %s1802_s10  ;;  %s2634_s19 = int_to_ptr.vmem [resolvable:$true] %s250_s19 }
  0x57   : > { %s264_s15 = scalar_lea.vmem [#allocation5], %s1780_s13  ;;  %s2647_s18 = scalar_lea.sflag [#allocation3], %s238_s12 }
  0x58   : > { %s2645_s17 = sshll.u32 %s264_s15, 4  ;;  %p2310_p0 = pneg %p2636_p11  ;;  %s2679_s17 = int_to_ptr.vmem [resolvable:$true] %s2645_s17 }
  0x5a   : > { %s2632_s16 = scalar_lea.hbm %s3821_s0, %s1802_s10  ;;  %s2313_s30 = scalar_lea.hbm %s3821_s0, 16384 }
  0x5b   : > { %s2308_s7 = scalar_lea.hbm %s2632_s16, 8192  ;;  %p2314_p13 = scmp.lt.u32.totalorder %s2632_s16, %s3821_s0 }
  0x5c   : > { %p2309_p12 = scmp.ne.s32.totalorder %s2632_s16, %s2308_s7  ;;  %p2315_p6 = scmp.lt.u32.totalorder %s2313_s30, %s2308_s7 }
  0x5d   : > { %p2317_p3 = scmp.lt.u32.totalorder %s2308_s7, %s2632_s16 }
  0x5e   : > { %p2311_p2 = pnand %p2310_p0, %p2309_p12  ;;  %p2316_p10 = por %p2315_p6, %p2314_p13 }
  0x60   : > { %p2312_p1 = pneg %p2311_p2  ;;  %p2318_p5 = por %p2317_p3, %p2316_p10 }
  0x62   : > { %p2319_p9 = pnand %p2318_p5, %p2312_p1 }
  0x64   : > { %2322 = shalt.err (!%p2319_p9)
}
  0x65   : > { %s2323_s12 = scalar_lea.vmem %s2634_s19, 8192  ;;  %s2454_s2 = smov [#allocation2]  }
  0x66   : > { %p2324_p12 = scmp.ne.s32.totalorder %s2634_s19, %s2323_s12  ;;  %s2328_s4 = sshll.u32 %s2454_s2, 4  ;;  %s2329_s4 = int_to_ptr.vmem [resolvable:$false] %s2328_s4 }
  0x67   : > { %s2330_s13 = scalar_lea.vmem %s2329_s4, 16384  ;;  %p2331_p4 = scmp.lt.s32.totalorder %s2634_s19, %s2329_s4 }
  0x68   : > { %p2326_p2 = pnand %p2324_p12, %p2310_p0  ;;  %p2332_p13 = scmp.lt.s32.totalorder %s2330_s13, %s2323_s12 }
  0x6a   : > { %p2327_p7 = pneg %p2326_p2  ;;  %p2333_p6 = por %p2332_p13, %p2331_p4 }
  0x6c   : > { %p2334_p10 = pnand %p2333_p6, %p2327_p7 }
  0x6e   : > { %2337 = shalt.err (!%p2334_p10)
}
  0x6f   : > { %s3823_s15 = smov 16   ;;  %s3824_s7 = smov 256  }
  0x70   : > { %1911 = dma.hbm_to_vmem [thread:$0]  (!%p2636_p11), %s2632_s16, 8192, %s2634_s19, %s2647_s18, %s3824_s7, %s3824_s7, %s3823_s15  }
  0x71   : > { %s260_s30 = sand.u32 1, %s2446_s24   ;;  %s2338_s10 = scalar_lea.hbm %s2643_s14, 8192 }
  0x72   : > { %s2682_s9 = scalar_lea.sflag [#allocation6], %s260_s30  ;;  %p2339_p4 = scmp.ne.s32.totalorder %s2643_s14, %s2338_s10 }
  0x73   : > { %s2343_s4 = scalar_lea.hbm %s3720_s1, 16384  ;;  %p2344_p3 = scmp.lt.u32.totalorder %s2643_s14, %s3720_s1 }
  0x74   : > { %p2341_p7 = pnand %p2339_p4, %p2310_p0  ;;  %p2345_p5 = scmp.lt.u32.totalorder %s2343_s4, %s2338_s10 }
  0x75   : > { %p2347_p12 = scmp.lt.u32.totalorder %s2338_s10, %s2643_s14 }
  0x76   : > { %p2342_p1 = pneg %p2341_p7  ;;  %p2346_p9 = por %p2345_p5, %p2344_p3 }
  0x78   : > { %p2348_p2 = por %p2347_p12, %p2346_p9 }
  0x7a   : > { %p2349_p13 = pnand %p2348_p2, %p2342_p1 }
  0x7c   : > { %2352 = shalt.err (!%p2349_p13)
}
  0x7d   : > { %s2353_s18 = scalar_lea.vmem %s2679_s17, 8192  ;;  %s2455_s16 = smov [#allocation5]  }
  0x7e   : > { %p2354_p6 = scmp.ne.s32.totalorder %s2679_s17, %s2353_s18  ;;  %s2358_s19 = sshll.u32 %s2455_s16, 4  ;;  %s2359_s19 = int_to_ptr.vmem [resolvable:$false] %s2358_s19 }
  0x7f   : > { %s2360_s0 = scalar_lea.vmem %s2359_s19, 16384  ;;  %p2361_p7 = scmp.lt.s32.totalorder %s2679_s17, %s2359_s19 }
  0x80   : > { %p2356_p10 = pnand %p2354_p6, %p2310_p0  ;;  %p2362_p3 = scmp.lt.s32.totalorder %s2360_s0, %s2353_s18 }
  0x82   : > { %p2357_p4 = pneg %p2356_p10  ;;  %p2363_p5 = por %p2362_p3, %p2361_p7 }
  0x84   : > { %p2364_p9 = pnand %p2363_p5, %p2357_p4 }
  0x86   : > { %2367 = shalt.err (!%p2364_p9)
}
  0x87   : > { %1914 = dma.hbm_to_vmem [thread:$0]  (!%p2636_p11), %s2643_s14, 8192, %s2679_s17, %s2682_s9, %s3824_s7, %s3824_s7, %s3823_s15  }
  0x88   : > { %284 = sbr.rel (%p2536_p8) target bundleno = 838 (0x346), region = 44 }
  0x8f   : > { %s2714_s30 = sand.u32 1, %s2438_s22   ;;  %p3825_p0 = scmp.ne.s32.totalorder %s3813_s27, 0 }
  0x90   : > { %s2717_s10 = sshll.u32 %s2714_s30, 9  ;;  %s287_s20 = scalar_lea.sflag [#allocation3], %s2714_s30 }
  0x91   : > { %s2721_s12 = scalar_lea.vmem [#allocation2], %s2717_s10 }
  0x92   : > { %2413 = dma.done.wait (%p3825_p0), %s287_s20, 8192  }
  0x93   : > { %2415 = vsyncadd (%p3825_p0), %s287_s20, 4294959104  ;;  %s295_s29 = sand.u32 1, %s2517_s25   ;;  %s2729_s14 = scalar_lea.vmem [#allocation5], %s2717_s10 }
  0x94   : > { %s296_s17 = scalar_lea.sflag [#allocation6], %s295_s29 }
  0x95   : > { %2417 = dma.done.wait (%p3825_p0), %s296_s17, 8192  }
  0x96   : > { %2419 = vsyncadd (%p3825_p0), %s296_s17, 4294959104  ;;  %p3826_p8 = scmp.eq.s32.totalorder %s2517_s25, 0 }
  0x98   : > { %2421 = dma.done.wait (%p3826_p8), [#allocation6], 4096   ;;  %p3827_p11 = pmov %p3826_p8 }
  0x99   : > { %p3828_p1 = pmov %p3826_p8 }
  0x9a   : > { %2423 = vsyncadd (%p3827_p11), [#allocation6], 4294963200 }
  0x9b   : > { %2425 = dma.done.wait (%p3828_p1), [#allocation9], 4096   ;;  %p3829_p12 = pmov %p3828_p1 }
  0x9c   : > { %v2456_v0 = vmov 0.0|0.0   ;;  %v472_v1 = vld [vmem:[#allocation7] sm:$0xff]  ;;  %v473_v2 = vld [vmem:[#allocation7 + $0x8] sm:$0xff]  ;;  %v474_v3 = vld [vmem:[#allocation7 + $0x10] sm:$0xff]  ;;  %s3294_s2 = scalar_lea.vmem [#allocation10], %s2717_s10  ;;  %s1806_s4 = sshll.u32 %s2517_s25, 13 }
  0x9d   : > { %2427 = vsyncadd (%p3829_p12), [#allocation9], 4294963200  ;;  %1807 = vmatprep.subr.bf16.mxu0 %v2456_v0  ;;  %v1808_v4 = vpack.c.bf16 %v473_v2, %v472_v1  ;;  %v475_v5 = vld [vmem:[#allocation7 + $0x18] sm:$0xff]  ;;  %v476_v7 = vld [vmem:[#allocation7 + $0x20] sm:$0xff]  ;;  %s1660_s13 = sshll.u32 %s3294_s2, 4  ;;  %s3671_s19 = scalar_lea.hbm %s3725_s6, %s1806_s4  ;;  %s3673_s13 = int_to_ptr.vmem [resolvable:$true] %s1660_s13 }
  0x9e   : > { %v1811_v6 = vpack.c.bf16 %v475_v5, %v474_v3  ;;  %v477_v8 = vld [vmem:[#allocation7 + $0x28] sm:$0xff]  ;;  %v478_v10 = vld [vmem:[#allocation7 + $0x30] sm:$0xff]  ;;  %v479_v11 = vld [vmem:[#allocation7 + $0x38] sm:$0xff]  ;;  %s1646_s25 = scalar_lea.sflag [#allocation4], %s2714_s30  ;;  %s2368_s0 = scalar_lea.vmem %s3673_s13, 8192 }
  0x9f   : > { %1809 = vmatpush1.bf16.msra.mxu0 %v1808_v4  ;;  %v1814_v9 = vpack.c.bf16 %v477_v8, %v476_v7  ;;  %v2747_v12 = vld [vmem:[%s2721_s12 + $0x8] sm:$0xff]  ;;  %v1817_v13 = vpack.c.bf16 %v479_v11, %v478_v10  ;;  %v480_v14 = vld [vmem:[#allocation7 + $0x40] sm:$0xff]  ;;  %v482_v17 = vld [vmem:[#allocation7 + $0x50] sm:$0xff]  ;;  %p2369_p2 = scmp.ne.s32.totalorder %s3673_s13, %s2368_s0  ;;  %p3981_p13 = scmp.ne.s32.totalorder %s3820_s8, 0 }
  0xa0   : > { %1810 = vmatprep.subr.bf16.mxu0 %v2456_v0  ;;  %575 = vmatprep.mubr.f32.mxu0 %v2747_v12  ;;  %v481_v15 = vld [vmem:[#allocation7 + $0x48] sm:$0xff]  ;;  %v483_v18 = vld [vmem:[#allocation7 + $0x58] sm:$0xff]  ;;  %v484_v20 = vld [vmem:[#allocation7 + $0x60] sm:$0xff]  ;;  %s2458_s10 = smov [#allocation10]  }
  0xa1   : > { %v1820_v16 = vpack.c.bf16 %v481_v15, %v480_v14  ;;  %v1823_v19 = vpack.c.bf16 %v483_v18, %v482_v17  ;;  %v485_v21 = vld [vmem:[#allocation7 + $0x68] sm:$0xff]  ;;  %v486_v23 = vld [vmem:[#allocation7 + $0x70] sm:$0xff]  ;;  %v487_v24 = vld [vmem:[#allocation7 + $0x78] sm:$0xff]  ;;  %p2370_p6 = pnand %p2369_p2, %p3981_p13  ;;  %s2372_s20 = sshll.u32 %s2458_s10, 4  ;;  %s2373_s20 = int_to_ptr.vmem [resolvable:$false] %s2372_s20 }
  0xa2   : > { %v1826_v22 = vpack.c.bf16 %v485_v21, %v484_v20  ;;  %v1829_v25 = vpack.c.bf16 %v487_v24, %v486_v23  ;;  %v488_v26 = vld [vmem:[#allocation7 + $0x80] sm:$0xff]  ;;  %v489_v27 = vld [vmem:[#allocation7 + $0x88] sm:$0xff]  ;;  %v490_v29 = vld [vmem:[#allocation7 + $0x90] sm:$0xff]  ;;  %p2375_p4 = scmp.lt.s32.totalorder %s3673_s13, %s2373_s20 }
  0xa3   : > { %1812 = vmatpush1.bf16.msra.mxu0 %v1811_v6  ;;  %v1832_v28 = vpack.c.bf16 %v489_v27, %v488_v26  ;;  %v491_v30 = vld [vmem:[#allocation7 + $0x98] sm:$0xff]  ;;  %v492_v32 = vld [vmem:[#allocation7 + $0xa0] sm:$0xff]  ;;  %v493_v33 = vld [vmem:[#allocation7 + $0xa8] sm:$0xff]  ;;  %p2371_p10 = pneg %p2370_p6 }
  0xa4   : > { %1813 = vmatprep.subr.bf16.mxu0 %v2456_v0  ;;  %v1835_v31 = vpack.c.bf16 %v491_v30, %v490_v29  ;;  %v1838_v34 = vpack.c.bf16 %v493_v33, %v492_v32  ;;  %v494_v35 = vld [vmem:[#allocation7 + $0xb0] sm:$0xff]  ;;  %v495_v36 = vld [vmem:[#allocation7 + $0xb8] sm:$0xff]  ;;  %v496_v38 = vld [vmem:[#allocation7 + $0xc0] sm:$0xff] }
  0xa5   : > { %v1841_v37 = vpack.c.bf16 %v495_v36, %v494_v35  ;;  %v497_v39 = vld [vmem:[#allocation7 + $0xc8] sm:$0xff]  ;;  %v498_v41 = vld [vmem:[#allocation7 + $0xd0] sm:$0xff]  ;;  %v499_v42 = vld [vmem:[#allocation7 + $0xd8] sm:$0xff] }
  0xa6   : > { %v1844_v40 = vpack.c.bf16 %v497_v39, %v496_v38  ;;  %v1847_v43 = vpack.c.bf16 %v499_v42, %v498_v41  ;;  %v500_v44 = vld [vmem:[#allocation7 + $0xe0] sm:$0xff]  ;;  %v501_v45 = vld [vmem:[#allocation7 + $0xe8] sm:$0xff]  ;;  %v502_v47 = vld [vmem:[#allocation7 + $0xf0] sm:$0xff] }
  0xa7   : > { %1815 = vmatpush1.bf16.msra.mxu0 %v1814_v9  ;;  %v1850_v46 = vpack.c.bf16 %v501_v45, %v500_v44  ;;  %v503_v48 = vld [vmem:[#allocation7 + $0xf8] sm:$0xff]  ;;  %v2764_v50 = vld [vmem:[%s2721_s12] sm:$0xff]  ;;  %v769_v52 = vld [vmem:[#allocation8 + $0x8] sm:$0xff] }
  0xa8   : > { %1816 = vmatprep.subr.bf16.mxu0 %v2456_v0  ;;  %v1853_v49 = vpack.c.bf16 %v503_v48, %v502_v47  ;;  %v2767_v51 = vld [vmem:[%s2721_s12 + $0x18] sm:$0xff]  ;;  %v768_v54 = vld [vmem:[#allocation8] sm:$0xff]  ;;  %v770_v56 = vld [vmem:[#allocation8 + $0x10] sm:$0xff] }
  0xa9   : > { %3830 = vst [vmem:[#allocation16_spill] sm:$0xff] %v2767_v51  ;;  %v771_v53 = vld [vmem:[#allocation8 + $0x18] sm:$0xff]  ;;  %v773_v57 = vld [vmem:[#allocation8 + $0x28] sm:$0xff]  ;;  %v1857_v59 = vpack.c.bf16 %v770_v56, %v768_v54  ;;  %v772_v61 = vld [vmem:[#allocation8 + $0x20] sm:$0xff] }
  0xaa   : > { %v1855_v55 = vpack.c.bf16 %v771_v53, %v769_v52  ;;  %v775_v58 = vld [vmem:[#allocation8 + $0x38] sm:$0xff]  ;;  %v774_v62 = vld [vmem:[#allocation8 + $0x30] sm:$0xff]  ;;  %v777_v63 = vld [vmem:[#allocation8 + $0x48] sm:$0xff] }
  0xab   : > { %1818 = vmatpush1.bf16.msra.mxu0 %v1817_v13  ;;  %v1859_v60 = vpack.c.bf16 %v775_v58, %v773_v57  ;;  %v1861_v1 = vpack.c.bf16 %v774_v62, %v772_v61  ;;  %v2772_v2 = vld [vmem:[%s2721_s12 + $0x10] sm:$0xff]  ;;  %v776_v4 = vld [vmem:[#allocation8 + $0x40] sm:$0xff]  ;;  %v2775_v6 = vld [vmem:[%s2721_s12 + $0x28] sm:$0xff] }
  0xac   : > { %1819 = vmatprep.subr.bf16.mxu0 %v2456_v0  ;;  %1856 = vmatprep.subr.bf16.mxu1 %v1855_v55  ;;  %v778_v5 = vld [vmem:[#allocation8 + $0x50] sm:$0xff]  ;;  %3831 = vst [vmem:[#allocation17_spill] sm:$0xff] %v2775_v6  ;;  %v781_v7 = vld [vmem:[#allocation8 + $0x68] sm:$0xff]  ;;  %v783_v8 = vld [vmem:[#allocation8 + $0x78] sm:$0xff] }
  0xad   : > { %1858 = vmatpush1.bf16.msra.mxu1 %v1857_v59  ;;  %v1865_v9 = vpack.c.bf16 %v778_v5, %v776_v4  ;;  %v2780_v10 = vld [vmem:[%s2721_s12 + $0x20] sm:$0xff]  ;;  %v1867_v11 = vpack.c.bf16 %v783_v8, %v781_v7  ;;  %v782_v14 = vld [vmem:[#allocation8 + $0x70] sm:$0xff]  ;;  %v2783_v15 = vld [vmem:[%s2721_s12 + $0x38] sm:$0xff] }
  0xae   : > { %1860 = vmatprep.subr.bf16.mxu1 %v1859_v60  ;;  %v780_v13 = vld [vmem:[#allocation8 + $0x60] sm:$0xff]  ;;  %v787_v17 = vld [vmem:[#allocation8 + $0x98] sm:$0xff]  ;;  %v2791_v23 = vld [vmem:[%s2721_s12 + $0x48] sm:$0xff] }
  0xaf   : > { %1821 = vmatpush1.bf16.msra.mxu0 %v1820_v16  ;;  %v785_v16 = vld [vmem:[#allocation8 + $0x88] sm:$0xff]  ;;  %v1869_v18 = vpack.c.bf16 %v782_v14, %v780_v13  ;;  %v784_v21 = vld [vmem:[#allocation8 + $0x80] sm:$0xff]  ;;  %3832 = vst [vmem:[#allocation18_spill] sm:$0xff] %v2791_v23  ;;  %v790_v30 = vld [vmem:[#allocation8 + $0xb0] sm:$0xff] }
  0xb0   : > { %1822 = vmatprep.subr.bf16.mxu0 %v2456_v0  ;;  %v1871_v20 = vpack.c.bf16 %v787_v17, %v785_v16  ;;  %v789_v24 = vld [vmem:[#allocation8 + $0xa8] sm:$0xff]  ;;  %v2796_v27 = vld [vmem:[%s2721_s12 + $0x40] sm:$0xff]  ;;  %v795_v33 = vld [vmem:[#allocation8 + $0xd8] sm:$0xff] }
  0xb1   : > { %1862 = vmatpush1.bf16.msra.mxu1 %v1861_v1  ;;  %v788_v29 = vld [vmem:[#allocation8 + $0xa0] sm:$0xff]  ;;  %v793_v32 = vld [vmem:[#allocation8 + $0xc8] sm:$0xff]  ;;  %v2804_v35 = vld [vmem:[%s2721_s12 + $0x50] sm:$0xff] }
  0xb2   : > { %v1879_v36 = vpack.c.bf16 %v795_v33, %v793_v32  ;;  %v794_v38 = vld [vmem:[#allocation8 + $0xd0] sm:$0xff]  ;;  %v2807_v39 = vld [vmem:[%s2721_s12 + $0x68] sm:$0xff]  ;;  %v2812_v41 = vld [vmem:[%s2721_s12 + $0x60] sm:$0xff] }
  0xb3   : > { %1824 = vmatpush1.bf16.msra.mxu0 %v1823_v19  ;;  %v2788_v19 = vld [vmem:[%s2721_s12 + $0x30] sm:$0xff]  ;;  %3834 = vst [vmem:[#allocation20_spill] sm:$0xff] %v2807_v39  ;;  %v2815_v42 = vld [vmem:[%s2721_s12 + $0x78] sm:$0xff]  ;;  %v2823_v44 = vld [vmem:[%s2721_s12 + $0x88] sm:$0xff] }
  0xb4   : > { %1825 = vmatprep.subr.bf16.mxu0 %v2456_v0  ;;  %3835 = vst [vmem:[#allocation21_spill] sm:$0xff] %v2823_v44  ;;  %v2828_v45 = vld [vmem:[%s2721_s12 + $0x80] sm:$0xff]  ;;  %v2836_v47 = vld [vmem:[%s2721_s12 + $0x90] sm:$0xff]  ;;  %v2839_v48 = vld [vmem:[%s2721_s12 + $0xa8] sm:$0xff] }
  0xb5   : > { %3837 = vst [vmem:[#allocation23_spill] sm:$0xff] %v2839_v48  ;;  %v2847_v52 = vld [vmem:[%s2721_s12 + $0xb8] sm:$0xff]  ;;  %v2852_v53 = vld [vmem:[%s2721_s12 + $0xb0] sm:$0xff]  ;;  %v2855_v54 = vld [vmem:[%s2721_s12 + $0xc8] sm:$0xff] }
  0xb6   : > { %3838 = vst [vmem:[#allocation24_spill] sm:$0xff] %v2847_v52  ;;  %v2860_v55 = vld [vmem:[%s2721_s12 + $0xc0] sm:$0xff]  ;;  %v2863_v56 = vld [vmem:[%s2721_s12 + $0xd8] sm:$0xff]  ;;  %v2868_v57 = vld [vmem:[%s2721_s12 + $0xd0] sm:$0xff] }
  0xb7   : > { %1827 = vmatpush1.bf16.msra.mxu0 %v1826_v22  ;;  %v786_v22 = vld [vmem:[#allocation8 + $0x90] sm:$0xff]  ;;  %3839 = vst [vmem:[#allocation25_spill] sm:$0xff] %v2863_v56  ;;  %v2871_v58 = vld [vmem:[%s2721_s12 + $0xe8] sm:$0xff]  ;;  %v2876_v59 = vld [vmem:[%s2721_s12 + $0xe0] sm:$0xff] }
  0xb8   : > { %1828 = vmatprep.subr.bf16.mxu0 %v2456_v0  ;;  %v1873_v26 = vpack.c.bf16 %v786_v22, %v784_v21  ;;  %3840 = vst [vmem:[#allocation26_spill] sm:$0xff] %v2871_v58  ;;  %3841 = vst [vmem:[#allocation27_spill] sm:$0xff] %v2876_v59  ;;  %v2879_v60 = vld [vmem:[%s2721_s12 + $0xf8] sm:$0xff]  ;;  %v2884_v61 = vld [vmem:[%s2721_s12 + $0xf0] sm:$0xff] }
  0xb9   : > { %v2887_v62 = vld [vmem:[%s2721_s12 + $0x108] sm:$0xff]  ;;  %v2900_v1 = vld [vmem:[%s2721_s12 + $0x110] sm:$0xff]  ;;  %v2908_v4 = vld [vmem:[%s2721_s12 + $0x120] sm:$0xff] }
  0xba   : > { %3842 = vst [vmem:[#allocation28_spill] sm:$0xff] %v2887_v62  ;;  %3845 = vst [vmem:[#allocation31_spill] sm:$0xff] %v2908_v4  ;;  %v2911_v5 = vld [vmem:[%s2721_s12 + $0x138] sm:$0xff]  ;;  %v2916_v7 = vld [vmem:[%s2721_s12 + $0x130] sm:$0xff] }
  0xbb   : > { %1830 = vmatpush1.bf16.msra.mxu0 %v1829_v25  ;;  %v791_v25 = vld [vmem:[#allocation8 + $0xb8] sm:$0xff]  ;;  %v2919_v8 = vld [vmem:[%s2721_s12 + $0x148] sm:$0xff]  ;;  %v2932_v13 = vld [vmem:[%s2721_s12 + $0x150] sm:$0xff] }
  0xbc   : > { %1831 = vmatprep.subr.bf16.mxu0 %v2456_v0  ;;  %3846 = vst [vmem:[#allocation32_spill] sm:$0xff] %v2919_v8  ;;  %3848 = vst [vmem:[#allocation34_spill] sm:$0xff] %v2932_v13  ;;  %v797_v14 = vld [vmem:[#allocation8 + $0xe8] sm:$0xff]  ;;  %v799_v16 = vld [vmem:[#allocation8 + $0xf8] sm:$0xff] }
  0xbd   : > { %v2935_v17 = vld [vmem:[%s2721_s12 + $0x168] sm:$0xff]  ;;  %v798_v21 = vld [vmem:[#allocation8 + $0xf0] sm:$0xff]  ;;  %v395_v32 = vld [vmem:[%s2721_s12 + $0x198] sm:$0xff] }
  0xbe   : > { %3849 = vst [vmem:[#allocation35_spill] sm:$0xff] %v2935_v17  ;;  %v394_v33 = vld [vmem:[%s2721_s12 + $0x190] sm:$0xff] }
  0xbf   : > { %1833 = vmatpush1.bf16.msra.mxu0 %v1832_v28  ;;  %v1875_v28 = vpack.c.bf16 %v791_v25, %v789_v24  ;;  %v2940_v24 = vld [vmem:[%s2721_s12 + $0x160] sm:$0xff]  ;;  %v2943_v25 = vld [vmem:[%s2721_s12 + $0x178] sm:$0xff] }
  0xc0   : > { %1834 = vmatprep.subr.bf16.mxu0 %v2456_v0  ;;  %3850 = vst [vmem:[#allocation36_spill] sm:$0xff] %v2940_v24  ;;  %3851 = vst [vmem:[#allocation37_spill] sm:$0xff] %v2943_v25 }
  0xc3   : > { %1836 = vmatpush1.bf16.msra.mxu0 %v1835_v31  ;;  %v2799_v31 = vld [vmem:[%s2721_s12 + $0x58] sm:$0xff] }
  0xc4   : > { %1837 = vmatprep.subr.bf16.mxu0 %v2456_v0  ;;  %3833 = vst [vmem:[#allocation19_spill] sm:$0xff] %v2799_v31 }
  0xc7   : > { %1839 = vmatpush1.bf16.msra.mxu0 %v1838_v34  ;;  %v1877_v34 = vpack.c.bf16 %v790_v30, %v788_v29  ;;  %v393_v29 = vld [vmem:[%s2721_s12 + $0x188] sm:$0xff]  ;;  %v392_v30 = vld [vmem:[%s2721_s12 + $0x180] sm:$0xff] }
  0xc8   : > { %1840 = vmatprep.subr.bf16.mxu0 %v2456_v0 }
  0xcb   : > { %1842 = vmatpush1.bf16.msra.mxu0 %v1841_v37  ;;  %v792_v37 = vld [vmem:[#allocation8 + $0xc0] sm:$0xff] }
  0xcc   : > { %1843 = vmatprep.subr.bf16.mxu0 %v2456_v0 }
  0xcf   : > { %1845 = vmatpush1.bf16.msra.mxu0 %v1844_v40  ;;  %v1881_v40 = vpack.c.bf16 %v794_v38, %v792_v37  ;;  %v399_v37 = vld [vmem:[%s2721_s12 + $0x1b8] sm:$0xff]  ;;  %v398_v38 = vld [vmem:[%s2721_s12 + $0x1b0] sm:$0xff] }
  0xd0   : > { %1846 = vmatprep.subr.bf16.mxu0 %v2456_v0 }
  0xd3   : > { %1848 = vmatpush1.bf16.msra.mxu0 %v1847_v43  ;;  %v2820_v43 = vld [vmem:[%s2721_s12 + $0x70] sm:$0xff] }
  0xd4   : > { %1849 = vmatprep.subr.bf16.mxu0 %v2456_v0 }
  0xd7   : > { %1851 = vmatpush1.bf16.msra.mxu0 %v1850_v46  ;;  %v2831_v46 = vld [vmem:[%s2721_s12 + $0x98] sm:$0xff] }
  0xd8   : > { %1852 = vmatprep.subr.bf16.mxu0 %v2456_v0  ;;  %v779_v0 = vld [vmem:[#allocation8 + $0x58] sm:$0xff]  ;;  %3836 = vst [vmem:[#allocation22_spill] sm:$0xff] %v2831_v46 }
  0xd9   : > { %v1863_v3 = vpack.c.bf16 %v779_v0, %v777_v63  ;;  %v2892_v63 = vld [vmem:[%s2721_s12 + $0x100] sm:$0xff]  ;;  %v2895_v0 = vld [vmem:[%s2721_s12 + $0x118] sm:$0xff] }
  0xda   : > { %3843 = vst [vmem:[#allocation29_spill] sm:$0xff] %v2892_v63 }
  0xdb   : > { %1854 = vmatpush1.bf16.msra.mxu0 %v1853_v49  ;;  %1864 = vmatprep.subr.bf16.mxu1 %v1863_v3  ;;  %v2844_v49 = vld [vmem:[%s2721_s12 + $0xa0] sm:$0xff]  ;;  %v2903_v3 = vld [vmem:[%s2721_s12 + $0x128] sm:$0xff] }
  0xdc   : > { %1866 = vmatpush1.bf16.msra.mxu1 %v1865_v9  ;;  %3844 = vst [vmem:[#allocation30_spill] sm:$0xff] %v2903_v3  ;;  %v2924_v9 = vld [vmem:[%s2721_s12 + $0x140] sm:$0xff] }
  0xdd   : > { %1868 = vmatprep.subr.bf16.mxu1 %v1867_v11  ;;  %v2927_v11 = vld [vmem:[%s2721_s12 + $0x158] sm:$0xff] }
  0xde   : > { %576 = vmatmul.mubr.f32.vlgmr.msra.gmra.mrb[0].mxu0 %v2764_v50  ;;  %3847 = vst [vmem:[#allocation33_spill] sm:$0xff] %v2927_v11 }
  0xdf   : > { %580 = vmatprep.mubr.f32.mxu0 %v2767_v51  ;;  %v3091_v51 = vld [vmem:[%s2729_s14 + $0x50] sm:$0xff] }
  0xe0   : > { %1870 = vmatpush1.bf16.msra.mxu1 %v1869_v18  ;;  %v1883_v18 = vpack.c.bf16 %v799_v16, %v797_v14  ;;  %v400_v14 = vld [vmem:[%s2721_s12 + $0x1c0] sm:$0xff]  ;;  %v403_v16 = vld [vmem:[%s2721_s12 + $0x1d8] sm:$0xff]  ;;  %3859 = vst [vmem:[#allocation45_spill] sm:$0xff] %v3091_v51  ;;  %v3136_v51 = vld [vmem:[%s2729_s14 + $0xa8] sm:$0xff] }
  0xe1   : > { %1872 = vmatprep.subr.bf16.mxu1 %v1871_v20  ;;  %v796_v20 = vld [vmem:[#allocation8 + $0xe0] sm:$0xff]  ;;  %3865 = vst [vmem:[#allocation51_spill] sm:$0xff] %v3136_v51 }
  0xe2   : > { %581 = vmatmul.mubr.f32.gmra.mrb[2].mxu0 %v2772_v2  ;;  %v1885_v22 = vpack.c.bf16 %v798_v21, %v796_v20  ;;  %v405_v20 = vld [vmem:[%s2721_s12 + $0x1e8] sm:$0xff]  ;;  %v404_v21 = vld [vmem:[%s2721_s12 + $0x1e0] sm:$0xff] }
  0xe3   : > { %585 = vmatprep.mubr.f32.mxu0 %v2775_v6  ;;  %v3102_v6 = vld [vmem:[%s2729_s14 + $0x60] sm:$0xff] }
  0xe4   : > { %1874 = vmatpush1.bf16.msra.mxu1 %v1873_v26  ;;  %v2457_v26 = vmov 0.0  }
  0xe5   : > { %1876 = vmatprep.subr.bf16.mxu1 %v1875_v28  ;;  %876 = vmatprep.mubr.f32.mxu1 %v2457_v26  ;;  %v390_v28 = vld [vmem:[%s2721_s12 + $0x170] sm:$0xff] }
  0xe6   : > { %586 = vmatmul.mubr.f32.gmra.mrb[4].mxu0 %v2780_v10 }
  0xe7   : > { %590 = vmatprep.mubr.f32.mxu0 %v2783_v15 }
  0xe8   : > { %1878 = vmatpush1.bf16.msra.mxu1 %v1877_v34  ;;  %v397_v34 = vld [vmem:[%s2721_s12 + $0x1a8] sm:$0xff] }
  0xe9   : > { %1880 = vmatprep.subr.bf16.mxu1 %v1879_v36  ;;  %v396_v36 = vld [vmem:[%s2721_s12 + $0x1a0] sm:$0xff] }
  0xea   : > { %591 = vmatmul.mubr.f32.gmra.mrb[6].mxu0 %v2788_v19 }
  0xeb   : > { %595 = vmatprep.mubr.f32.mxu0 %v2791_v23  ;;  %v3125_v23 = vld [vmem:[%s2729_s14 + $0x98] sm:$0xff] }
  0xec   : > { %1882 = vmatpush1.bf16.msra.mxu1 %v1881_v40  ;;  %v401_v40 = vld [vmem:[%s2721_s12 + $0x1c8] sm:$0xff]  ;;  %3864 = vst [vmem:[#allocation50_spill] sm:$0xff] %v3125_v23 }
  0xed   : > { %1884 = vmatprep.subr.bf16.mxu1 %v1883_v18  ;;  %v402_v18 = vld [vmem:[%s2721_s12 + $0x1d0] sm:$0xff] }
  0xee   : > { %596 = vmatmul.mubr.f32.gmra.mrb[8].mxu0 %v2796_v27 }
  0xef   : > { %600 = vmatprep.mubr.f32.mxu0 %v2799_v31 }
  0xf0   : > { %1886 = vmatpush1.bf16.msra.mxu1 %v1885_v22  ;;  %v407_v22 = vld [vmem:[%s2721_s12 + $0x1f8] sm:$0xff] }
  0xf2   : > { %601 = vmatmul.mubr.f32.gmra.mrb[10].mxu0 %v2804_v35 }
  0xf3   : > { %605 = vmatprep.mubr.f32.mxu0 %v2807_v39  ;;  %v3144_v39 = vld [vmem:[%s2729_s14 + $0xa0] sm:$0xff] }
  0xf6   : > { %606 = vmatmul.mubr.f32.gmra.mrb[12].mxu0 %v2812_v41 }
  0xf7   : > { %610 = vmatprep.mubr.f32.mxu0 %v2815_v42 }
  0xfa   : > { %611 = vmatmul.mubr.f32.gmra.mrb[14].mxu0 %v2820_v43 }
  0xfb   : > { %615 = vmatprep.mubr.f32.mxu0 %v2823_v44  ;;  %v3167_v44 = vld [vmem:[%s2729_s14 + $0xd8] sm:$0xff] }
  0xfc   : > { %3868 = vst [vmem:[#allocation54_spill] sm:$0xff] %v3167_v44 }
  0xfe   : > { %616 = vmatmul.mubr.f32.gmra.mrb[16].mxu0 %v2828_v45 }
  0xff   : > { %620 = vmatprep.mubr.f32.mxu0 %v2831_v46 }
 0x102   : > { %621 = vmatmul.mubr.f32.gmra.mrb[18].mxu0 %v2836_v47 }
 0x103   : > { %625 = vmatprep.mubr.f32.mxu0 %v2839_v48  ;;  %v3186_v48 = vld [vmem:[%s2729_s14 + $0xe0] sm:$0xff] }
 0x104   : > { %3871 = vst [vmem:[#allocation57_spill] sm:$0xff] %v3186_v48  ;;  %v3219_v48 = vld [vmem:[%s2729_s14 + $0x118] sm:$0xff] }
 0x105   : > { %3874 = vst [vmem:[#allocation60_spill] sm:$0xff] %v3219_v48  ;;  %v3268_v48 = vld [vmem:[%s2729_s14 + $0x150] sm:$0xff] }
 0x106   : > { %626 = vmatmul.mubr.f32.gmra.mrb[20].mxu0 %v2844_v49  ;;  %3880 = vst [vmem:[#allocation66_spill] sm:$0xff] %v3268_v48 }
 0x107   : > { %630 = vmatprep.mubr.f32.mxu0 %v2847_v52 }
 0x10a   : > { %631 = vmatmul.mubr.f32.gmra.mrb[22].mxu0 %v2852_v53 }
 0x10b   : > { %635 = vmatprep.mubr.f32.mxu0 %v2855_v54 }
 0x10e   : > { %636 = vmatmul.mubr.f32.gmra.mrb[24].mxu0 %v2860_v55 }
 0x10f   : > { %640 = vmatprep.mubr.f32.mxu0 %v2863_v56 }
 0x112   : > { %641 = vmatmul.mubr.f32.gmra.mrb[26].mxu0 %v2868_v57 }
 0x113   : > { %645 = vmatprep.mubr.f32.mxu0 %v2871_v58 }
 0x116   : > { %646 = vmatmul.mubr.f32.gmra.mrb[28].mxu0 %v2876_v59 }
 0x117   : > { %650 = vmatprep.mubr.f32.mxu0 %v2879_v60 }
 0x11a   : > { %651 = vmatmul.mubr.f32.gmra.mrb[30].mxu0 %v2884_v61 }
 0x11b   : > { %655 = vmatprep.mubr.f32.mxu0 %v2887_v62  ;;  %v3246_v62 = vld [vmem:[%s2729_s14 + $0x130] sm:$0xff] }
 0x11e   : > { %656 = vmatmul.mubr.f32.gmra.mrb[32].mxu0 %v2892_v63 }
 0x11f   : > { %660 = vmatprep.mubr.f32.mxu0 %v2895_v0 }
 0x122   : > { %661 = vmatmul.mubr.f32.gmra.mrb[34].mxu0 %v2900_v1 }
 0x123   : > { %665 = vmatprep.mubr.f32.mxu0 %v2903_v3 }
 0x126   : > { %666 = vmatmul.mubr.f32.gmra.mrb[36].mxu0 %v2908_v4  ;;  %v3263_v4 = vld [vmem:[%s2729_s14 + $0x158] sm:$0xff] }
 0x127   : > { %670 = vmatprep.mubr.f32.mxu0 %v2911_v5  ;;  %3879 = vst [vmem:[#allocation65_spill] sm:$0xff] %v3263_v4 }
 0x12a   : > { %671 = vmatmul.mubr.f32.gmra.mrb[38].mxu0 %v2916_v7 }
 0x12b   : > { %675 = vmatprep.mubr.f32.mxu0 %v2919_v8 }
 0x12e   : > { %676 = vmatmul.mubr.f32.gmra.mrb[40].mxu0 %v2924_v9 }
 0x12f   : > { %680 = vmatprep.mubr.f32.mxu0 %v2927_v11  ;;  %v3286_v11 = vld [vmem:[%s2729_s14 + $0x160] sm:$0xff] }
 0x132   : > { %681 = vmatmul.mubr.f32.gmra.mrb[42].mxu0 %v2932_v13 }
 0x133   : > { %685 = vmatprep.mubr.f32.mxu0 %v2935_v17  ;;  %v3080_v17 = vld [vmem:[%s2729_s14 + $0x40] sm:$0xff] }
 0x136   : > { %686 = vmatmul.mubr.f32.gmra.mrb[44].mxu0 %v2940_v24 }
 0x137   : > { %690 = vmatprep.mubr.f32.mxu0 %v2943_v25  ;;  %v3073_v25 = vld [vmem:[%s2729_s14 + $0x48] sm:$0xff] }
 0x138   : > { %3857 = vst [vmem:[#allocation43_spill] sm:$0xff] %v3073_v25 }
 0x13a   : > { %691 = vmatmul.mubr.f32.gmra.mrb[46].mxu0 %v390_v28  ;;  %v406_v28 = vld [vmem:[%s2721_s12 + $0x1f0] sm:$0xff] }
 0x13b   : > { %695 = vmatprep.mubr.f32.mxu0 %v393_v29  ;;  %v2968_v29 = vld [vmem:[%s3722_s3] ss:$0 sm:$0xff] }
 0x13e   : > { %696 = vmatmul.mubr.f32.gmra.mrb[48].mxu0 %v392_v30 }
 0x13f   : > { %700 = vmatprep.mubr.f32.mxu0 %v395_v32 }
 0x142   : > { %701 = vmatmul.mubr.f32.gmra.mrb[50].mxu0 %v394_v33 }
 0x143   : > { %705 = vmatprep.mubr.f32.mxu0 %v397_v34 }
 0x146   : > { %706 = vmatmul.mubr.f32.gmra.mrb[52].mxu0 %v396_v36 }
 0x147   : > { %710 = vmatprep.mubr.f32.mxu0 %v399_v37 }
 0x14a   : > { %711 = vmatmul.mubr.f32.gmra.mrb[54].mxu0 %v398_v38 }
 0x14b   : > { %715 = vmatprep.mubr.f32.mxu0 %v401_v40 }
 0x14e   : > { %716 = vmatmul.mubr.f32.gmra.mrb[56].mxu0 %v400_v14 }
 0x14f   : > { %720 = vmatprep.mubr.f32.mxu0 %v403_v16 }
 0x152   : > { %721 = vmatmul.mubr.f32.gmra.mrb[58].mxu0 %v402_v18 }
 0x153   : > { %725 = vmatprep.mubr.f32.mxu0 %v405_v20 }
 0x156   : > { %726 = vmatmul.mubr.f32.gmra.mrb[60].mxu0 %v404_v21 }
 0x157   : > { %730 = vmatprep.mubr.f32.mxu0 %v407_v22 }
 0x15a   : > { %731 = vmatmul.mubr.f32.gmra.mrb[62].mxu0 %v406_v28 }
 0x1b1   : > { %v577_v30 = vpop.f32.mrb[0].mxu0 }
 0x1b2   : > { %v578_v32 = vadd.f32 %v2968_v29, %v577_v30  ;;  %v579_v33 = vpop.f32.mrb[1].mxu0 }
 0x1b4   : > { %v736_v34 = vmax.f32 %v578_v32, 0.0 }
 0x1b5   : > { %v582_v36 = vpop.f32.mrb[2].mxu0 }
 0x1b6   : > { %v583_v37 = vadd.f32 %v2968_v29, %v582_v36  ;;  %v584_v38 = vpop.f32.mrb[3].mxu0  ;;  %877 = vmatmul.mubr.f32.vlgmr.msra.gmra.mrb[0].mxu1 %v736_v34 }
 0x1b7   : > { %882 = vmatprep.mubr.f32.mxu1 %v2457_v26 }
 0x1b8   : > { %v737_v40 = vmax.f32 %v583_v37, 0.0 }
 0x1b9   : > { %v587_v14 = vpop.f32.mrb[4].mxu0 }
 0x1ba   : > { %v588_v16 = vadd.f32 %v2968_v29, %v587_v14  ;;  %v589_v18 = vpop.f32.mrb[5].mxu0  ;;  %883 = vmatmul.mubr.f32.gmra.mrb[2].mxu1 %v737_v40 }
 0x1bb   : > { %888 = vmatprep.mubr.f32.mxu1 %v2457_v26 }
 0x1bc   : > { %v738_v20 = vmax.f32 %v588_v16, 0.0 }
 0x1bd   : > { %v592_v21 = vpop.f32.mrb[6].mxu0 }
 0x1be   : > { %v593_v22 = vadd.f32 %v2968_v29, %v592_v21  ;;  %v594_v28 = vpop.f32.mrb[7].mxu0  ;;  %889 = vmatmul.mubr.f32.gmra.mrb[4].mxu1 %v738_v20 }
 0x1bf   : > { %894 = vmatprep.mubr.f32.mxu1 %v2457_v26 }
 0x1c0   : > { %v739_v30 = vmax.f32 %v593_v22, 0.0 }
 0x1c1   : > { %v597_v32 = vpop.f32.mrb[8].mxu0 }
 0x1c2   : > { %v598_v33 = vadd.f32 %v2968_v29, %v597_v32  ;;  %v599_v34 = vpop.f32.mrb[9].mxu0  ;;  %895 = vmatmul.mubr.f32.gmra.mrb[6].mxu1 %v739_v30 }
 0x1c3   : > { %900 = vmatprep.mubr.f32.mxu1 %v2457_v26 }
 0x1c4   : > { %v740_v36 = vmax.f32 %v598_v33, 0.0 }
 0x1c5   : > { %v602_v37 = vpop.f32.mrb[10].mxu0 }
 0x1c6   : > { %v603_v38 = vadd.f32 %v2968_v29, %v602_v37  ;;  %v604_v40 = vpop.f32.mrb[11].mxu0  ;;  %901 = vmatmul.mubr.f32.gmra.mrb[8].mxu1 %v740_v36 }
 0x1c7   : > { %906 = vmatprep.mubr.f32.mxu1 %v2457_v26 }
 0x1c8   : > { %v741_v14 = vmax.f32 %v603_v38, 0.0 }
 0x1c9   : > { %v607_v16 = vpop.f32.mrb[12].mxu0 }
 0x1ca   : > { %v608_v18 = vadd.f32 %v2968_v29, %v607_v16  ;;  %v609_v20 = vpop.f32.mrb[13].mxu0  ;;  %907 = vmatmul.mubr.f32.gmra.mrb[10].mxu1 %v741_v14 }
 0x1cb   : > { %912 = vmatprep.mubr.f32.mxu1 %v2457_v26 }
 0x1cc   : > { %v742_v21 = vmax.f32 %v608_v18, 0.0 }
 0x1cd   : > { %v612_v22 = vpop.f32.mrb[14].mxu0 }
 0x1ce   : > { %v613_v28 = vadd.f32 %v2968_v29, %v612_v22  ;;  %v614_v30 = vpop.f32.mrb[15].mxu0  ;;  %913 = vmatmul.mubr.f32.gmra.mrb[12].mxu1 %v742_v21 }
 0x1cf   : > { %918 = vmatprep.mubr.f32.mxu1 %v2457_v26 }
 0x1d0   : > { %v743_v32 = vmax.f32 %v613_v28, 0.0 }
 0x1d1   : > { %v617_v33 = vpop.f32.mrb[16].mxu0 }
 0x1d2   : > { %v618_v34 = vadd.f32 %v2968_v29, %v617_v33  ;;  %v619_v36 = vpop.f32.mrb[17].mxu0  ;;  %919 = vmatmul.mubr.f32.gmra.mrb[14].mxu1 %v743_v32 }
 0x1d3   : > { %924 = vmatprep.mubr.f32.mxu1 %v2457_v26 }
 0x1d4   : > { %v744_v37 = vmax.f32 %v618_v34, 0.0 }
 0x1d5   : > { %v622_v38 = vpop.f32.mrb[18].mxu0 }
 0x1d6   : > { %v623_v40 = vadd.f32 %v2968_v29, %v622_v38  ;;  %v624_v14 = vpop.f32.mrb[19].mxu0  ;;  %925 = vmatmul.mubr.f32.gmra.mrb[16].mxu1 %v744_v37 }
 0x1d7   : > { %930 = vmatprep.mubr.f32.mxu1 %v2457_v26 }
 0x1d8   : > { %v745_v16 = vmax.f32 %v623_v40, 0.0 }
 0x1d9   : > { %v627_v18 = vpop.f32.mrb[20].mxu0 }
 0x1da   : > { %v628_v20 = vadd.f32 %v2968_v29, %v627_v18  ;;  %v629_v21 = vpop.f32.mrb[21].mxu0  ;;  %931 = vmatmul.mubr.f32.gmra.mrb[18].mxu1 %v745_v16 }
 0x1db   : > { %936 = vmatprep.mubr.f32.mxu1 %v2457_v26 }
 0x1dc   : > { %v746_v22 = vmax.f32 %v628_v20, 0.0 }
 0x1dd   : > { %v632_v28 = vpop.f32.mrb[22].mxu0 }
 0x1de   : > { %v633_v30 = vadd.f32 %v2968_v29, %v632_v28  ;;  %v634_v32 = vpop.f32.mrb[23].mxu0  ;;  %937 = vmatmul.mubr.f32.gmra.mrb[20].mxu1 %v746_v22 }
 0x1df   : > { %942 = vmatprep.mubr.f32.mxu1 %v2457_v26 }
 0x1e0   : > { %v747_v33 = vmax.f32 %v633_v30, 0.0 }
 0x1e1   : > { %v637_v34 = vpop.f32.mrb[24].mxu0 }
 0x1e2   : > { %v638_v36 = vadd.f32 %v2968_v29, %v637_v34  ;;  %v639_v37 = vpop.f32.mrb[25].mxu0  ;;  %943 = vmatmul.mubr.f32.gmra.mrb[22].mxu1 %v747_v33 }
 0x1e3   : > { %948 = vmatprep.mubr.f32.mxu1 %v2457_v26 }
 0x1e4   : > { %v748_v38 = vmax.f32 %v638_v36, 0.0 }
 0x1e5   : > { %v642_v40 = vpop.f32.mrb[26].mxu0 }
 0x1e6   : > { %v643_v14 = vadd.f32 %v2968_v29, %v642_v40  ;;  %v644_v16 = vpop.f32.mrb[27].mxu0  ;;  %949 = vmatmul.mubr.f32.gmra.mrb[24].mxu1 %v748_v38 }
 0x1e7   : > { %954 = vmatprep.mubr.f32.mxu1 %v2457_v26 }
 0x1e8   : > { %v749_v18 = vmax.f32 %v643_v14, 0.0 }
 0x1e9   : > { %v647_v20 = vpop.f32.mrb[28].mxu0 }
 0x1ea   : > { %v648_v21 = vadd.f32 %v2968_v29, %v647_v20  ;;  %v649_v22 = vpop.f32.mrb[29].mxu0  ;;  %955 = vmatmul.mubr.f32.gmra.mrb[26].mxu1 %v749_v18 }
 0x1eb   : > { %960 = vmatprep.mubr.f32.mxu1 %v2457_v26 }
 0x1ec   : > { %v750_v28 = vmax.f32 %v648_v21, 0.0 }
 0x1ed   : > { %v652_v30 = vpop.f32.mrb[30].mxu0 }
 0x1ee   : > { %v653_v32 = vadd.f32 %v2968_v29, %v652_v30  ;;  %v654_v33 = vpop.f32.mrb[31].mxu0  ;;  %961 = vmatmul.mubr.f32.gmra.mrb[28].mxu1 %v750_v28 }
 0x1ef   : > { %966 = vmatprep.mubr.f32.mxu1 %v2457_v26 }
 0x1f0   : > { %v751_v34 = vmax.f32 %v653_v32, 0.0 }
 0x1f1   : > { %v657_v36 = vpop.f32.mrb[32].mxu0 }
 0x1f2   : > { %v658_v37 = vadd.f32 %v2968_v29, %v657_v36  ;;  %v659_v38 = vpop.f32.mrb[33].mxu0  ;;  %967 = vmatmul.mubr.f32.gmra.mrb[30].mxu1 %v751_v34 }
 0x1f3   : > { %972 = vmatprep.mubr.f32.mxu1 %v2457_v26 }
 0x1f4   : > { %v752_v40 = vmax.f32 %v658_v37, 0.0 }
 0x1f5   : > { %v662_v14 = vpop.f32.mrb[34].mxu0 }
 0x1f6   : > { %v663_v16 = vadd.f32 %v2968_v29, %v662_v14  ;;  %v664_v18 = vpop.f32.mrb[35].mxu0  ;;  %973 = vmatmul.mubr.f32.gmra.mrb[32].mxu1 %v752_v40 }
 0x1f7   : > { %978 = vmatprep.mubr.f32.mxu1 %v2457_v26 }
 0x1f8   : > { %v753_v20 = vmax.f32 %v663_v16, 0.0 }
 0x1f9   : > { %v667_v21 = vpop.f32.mrb[36].mxu0 }
 0x1fa   : > { %v668_v22 = vadd.f32 %v2968_v29, %v667_v21  ;;  %v669_v28 = vpop.f32.mrb[37].mxu0  ;;  %979 = vmatmul.mubr.f32.gmra.mrb[34].mxu1 %v753_v20 }
 0x1fb   : > { %984 = vmatprep.mubr.f32.mxu1 %v2457_v26 }
 0x1fc   : > { %v754_v30 = vmax.f32 %v668_v22, 0.0 }
 0x1fd   : > { %v672_v32 = vpop.f32.mrb[38].mxu0 }
 0x1fe   : > { %v673_v33 = vadd.f32 %v2968_v29, %v672_v32  ;;  %v674_v34 = vpop.f32.mrb[39].mxu0  ;;  %985 = vmatmul.mubr.f32.gmra.mrb[36].mxu1 %v754_v30 }
 0x1ff   : > { %990 = vmatprep.mubr.f32.mxu1 %v2457_v26 }
 0x200   : > { %v755_v36 = vmax.f32 %v673_v33, 0.0 }
 0x201   : > { %v677_v37 = vpop.f32.mrb[40].mxu0 }
 0x202   : > { %v678_v38 = vadd.f32 %v2968_v29, %v677_v37  ;;  %v679_v40 = vpop.f32.mrb[41].mxu0  ;;  %991 = vmatmul.mubr.f32.gmra.mrb[38].mxu1 %v755_v36 }
 0x203   : > { %996 = vmatprep.mubr.f32.mxu1 %v2457_v26 }
 0x204   : > { %v756_v14 = vmax.f32 %v678_v38, 0.0 }
 0x205   : > { %v682_v16 = vpop.f32.mrb[42].mxu0 }
 0x206   : > { %v683_v18 = vadd.f32 %v2968_v29, %v682_v16  ;;  %v684_v20 = vpop.f32.mrb[43].mxu0  ;;  %997 = vmatmul.mubr.f32.gmra.mrb[40].mxu1 %v756_v14 }
 0x207   : > { %1002 = vmatprep.mubr.f32.mxu1 %v2457_v26 }
 0x208   : > { %v757_v21 = vmax.f32 %v683_v18, 0.0 }
 0x209   : > { %v687_v22 = vpop.f32.mrb[44].mxu0 }
 0x20a   : > { %v688_v28 = vadd.f32 %v2968_v29, %v687_v22  ;;  %v689_v30 = vpop.f32.mrb[45].mxu0  ;;  %1003 = vmatmul.mubr.f32.gmra.mrb[42].mxu1 %v757_v21 }
 0x20b   : > { %1008 = vmatprep.mubr.f32.mxu1 %v2457_v26 }
 0x20c   : > { %v758_v32 = vmax.f32 %v688_v28, 0.0 }
 0x20d   : > { %v692_v33 = vpop.f32.mrb[46].mxu0 }
 0x20e   : > { %v693_v34 = vadd.f32 %v2968_v29, %v692_v33  ;;  %v694_v36 = vpop.f32.mrb[47].mxu0  ;;  %1009 = vmatmul.mubr.f32.gmra.mrb[44].mxu1 %v758_v32 }
 0x20f   : > { %1014 = vmatprep.mubr.f32.mxu1 %v2457_v26 }
 0x210   : > { %v759_v37 = vmax.f32 %v693_v34, 0.0 }
 0x211   : > { %v697_v38 = vpop.f32.mrb[48].mxu0 }
 0x212   : > { %v698_v40 = vadd.f32 %v2968_v29, %v697_v38  ;;  %v699_v14 = vpop.f32.mrb[49].mxu0  ;;  %1015 = vmatmul.mubr.f32.gmra.mrb[46].mxu1 %v759_v37 }
 0x213   : > { %1020 = vmatprep.mubr.f32.mxu1 %v2457_v26 }
 0x214   : > { %v760_v16 = vmax.f32 %v698_v40, 0.0 }
 0x215   : > { %v702_v18 = vpop.f32.mrb[50].mxu0 }
 0x216   : > { %v703_v20 = vadd.f32 %v2968_v29, %v702_v18  ;;  %v704_v21 = vpop.f32.mrb[51].mxu0  ;;  %1021 = vmatmul.mubr.f32.gmra.mrb[48].mxu1 %v760_v16 }
 0x217   : > { %1026 = vmatprep.mubr.f32.mxu1 %v2457_v26 }
 0x218   : > { %v761_v22 = vmax.f32 %v703_v20, 0.0 }
 0x219   : > { %v707_v28 = vpop.f32.mrb[52].mxu0 }
 0x21a   : > { %v708_v30 = vadd.f32 %v2968_v29, %v707_v28  ;;  %v709_v32 = vpop.f32.mrb[53].mxu0  ;;  %1027 = vmatmul.mubr.f32.gmra.mrb[50].mxu1 %v761_v22 }
 0x21b   : > { %1032 = vmatprep.mubr.f32.mxu1 %v2457_v26 }
 0x21c   : > { %v762_v33 = vmax.f32 %v708_v30, 0.0 }
 0x21d   : > { %v712_v34 = vpop.f32.mrb[54].mxu0 }
 0x21e   : > { %v713_v36 = vadd.f32 %v2968_v29, %v712_v34  ;;  %v714_v37 = vpop.f32.mrb[55].mxu0  ;;  %1033 = vmatmul.mubr.f32.gmra.mrb[52].mxu1 %v762_v33 }
 0x21f   : > { %1038 = vmatprep.mubr.f32.mxu1 %v2457_v26 }
 0x220   : > { %v763_v38 = vmax.f32 %v713_v36, 0.0 }
 0x221   : > { %v717_v40 = vpop.f32.mrb[56].mxu0 }
 0x222   : > { %v718_v14 = vadd.f32 %v2968_v29, %v717_v40  ;;  %v719_v16 = vpop.f32.mrb[57].mxu0  ;;  %1039 = vmatmul.mubr.f32.gmra.mrb[54].mxu1 %v763_v38 }
 0x223   : > { %1044 = vmatprep.mubr.f32.mxu1 %v2457_v26 }
 0x224   : > { %v764_v18 = vmax.f32 %v718_v14, 0.0  ;;  %v802_v14 = vlaneseq }
 0x225   : > { %v722_v20 = vpop.f32.mrb[58].mxu0 }
 0x226   : > { %v723_v21 = vadd.f32 %v2968_v29, %v722_v20  ;;  %v724_v22 = vpop.f32.mrb[59].mxu0  ;;  %1045 = vmatmul.mubr.f32.gmra.mrb[56].mxu1 %v764_v18  ;;  %v803_v16 = vshrl.u32 %v802_v14, 7  ;;  %v800_v20 = vld [vmem:[%s3724_s5] sm:$0x3]  ;;  %v3061_v14 = vld [vmem:[%s2729_s14 + $0x38] sm:$0xff] }
 0x227   : > { %1050 = vmatprep.mubr.f32.mxu1 %v2457_v26  ;;  %3856 = vst [vmem:[#allocation42_spill] sm:$0xff] %v3061_v14  ;;  %v3122_v14 = vld [vmem:[%s2729_s14 + $0x80] sm:$0xff] }
 0x228   : > { %v765_v28 = vmax.f32 %v723_v21, 0.0  ;;  %v804_v18 = vsub.s32 0, %v803_v16  ;;  %v808_v21 = vsub.s32 1, %v803_v16  ;;  %3863 = vst [vmem:[#allocation49_spill] sm:$0xff] %v3122_v14  ;;  %v3175_v14 = vld [vmem:[%s2729_s14 + $0xd0] sm:$0xff] }
 0x229   : > { %v727_v30 = vpop.f32.mrb[60].mxu0  ;;  %3869 = vst [vmem:[#allocation55_spill] sm:$0xff] %v3175_v14 }
 0x22a   : > { %v728_v32 = vadd.f32 %v2968_v29, %v727_v30  ;;  %v729_v33 = vpop.f32.mrb[61].mxu0  ;;  %1051 = vmatmul.mubr.f32.gmra.mrb[58].mxu1 %v765_v28  ;;  %v3038_v22 = vrot.slane %v800_v20, %v808_v21  ;;  %v3041_v28 = vld [vmem:[%s2729_s14 + $0x8] sm:$0xff]  ;;  %v3044_v30 = vld [vmem:[%s2729_s14] sm:$0xff] }
 0x22b   : > { %1056 = vmatprep.mubr.f32.mxu1 %v2457_v26  ;;  %3852 = vst [vmem:[#allocation38_spill] sm:$0xff] %v3041_v28 }
 0x22c   : > { %v766_v34 = vmax.f32 %v728_v32, 0.0  ;;  %v3047_v32 = vld [vmem:[%s2729_s14 + $0x18] sm:$0xff] }
 0x22d   : > { %v732_v36 = vpop.f32.mrb[62].mxu0  ;;  %3853 = vst [vmem:[#allocation39_spill] sm:$0xff] %v3047_v32 }
 0x22e   : > { %v733_v37 = vadd.f32 %v2968_v29, %v732_v36  ;;  %v734_v38 = vpop.f32.mrb[63].mxu0  ;;  %1057 = vmatmul.mubr.f32.gmra.mrb[60].mxu1 %v766_v34  ;;  %v3036_v29 = vrot.slane %v800_v20, %v804_v18  ;;  %v3051_v36 = vld [vmem:[%s2729_s14 + $0x10] sm:$0xff]  ;;  %v3083_v20 = vld [vmem:[%s2729_s14 + $0x58] sm:$0xff] }
 0x22f   : > { %1062 = vmatprep.mubr.f32.mxu1 %v2457_v26  ;;  %3854 = vst [vmem:[#allocation40_spill] sm:$0xff] %v3051_v36  ;;  %3858 = vst [vmem:[#allocation44_spill] sm:$0xff] %v3083_v20  ;;  %v3094_v36 = vld [vmem:[%s2729_s14 + $0x68] sm:$0xff] }
 0x230   : > { %v767_v40 = vmax.f32 %v733_v37, 0.0  ;;  %v3054_v37 = vld [vmem:[%s2729_s14 + $0x28] sm:$0xff]  ;;  %3860 = vst [vmem:[#allocation46_spill] sm:$0xff] %v3094_v36 }
 0x231   : > { %3855 = vst [vmem:[#allocation41_spill] sm:$0xff] %v3054_v37 }
 0x232   : > { %1063 = vmatmul.mubr.f32.gmra.mrb[62].mxu1 %v767_v40  ;;  %v3058_v40 = vld [vmem:[%s2729_s14 + $0x20] sm:$0xff] }
 0x289   : > { %v878_v26 = vpop.f32.mrb[0].mxu1 }
 0x28a   : > { %v879_v33 = vadd.f32 %v878_v26, %v3036_v29  ;;  %v880_v34 = vpop.f32.mrb[1].mxu1  ;;  %v3070_v26 = vld [vmem:[%s2729_s14 + $0x30] sm:$0xff] }
 0x28b   : > { %v881_v38 = vadd.f32 %v880_v34, %v3038_v22 }
 0x28c   : > { %v1069_v16 = vsub.f32 0.0, %v879_v33 }
 0x28d   : > { %v1070_v34 = vsub.f32 0.0, %v881_v38  ;;  %v884_v24 = vpop.f32.mrb[2].mxu1  ;;  %v3105_v38 = vld [vmem:[%s2729_s14 + $0x78] sm:$0xff] }
 0x28e   : > { %v1133_v28 = vmul.f32 1.442695, %v1069_v16  ;;  %v885_v21 = vadd.f32 %v884_v24, %v3036_v29  ;;  %v886_v32 = vpop.f32.mrb[3].mxu1  ;;  %3861 = vst [vmem:[#allocation47_spill] sm:$0xff] %v3105_v38  ;;  %v3115_v24 = vld [vmem:[%s2729_s14 + $0x88] sm:$0xff]  ;;  %v3164_v38 = vld [vmem:[%s2729_s14 + $0xc0] sm:$0xff] }
 0x28f   : > { %v1135_v18 = vmul.f32 1.442695, %v1070_v34  ;;  %v887_v37 = vadd.f32 %v886_v32, %v3038_v22  ;;  %v3112_v34 = vld [vmem:[%s2729_s14 + $0x70] sm:$0xff]  ;;  %3862 = vst [vmem:[#allocation48_spill] sm:$0xff] %v3115_v24 }
 0x290   : > { %1967 = vpow2.f32 %v1133_v28  ;;  %v1071_v33 = vsub.f32 0.0, %v885_v21  ;;  %v3133_v28 = vld [vmem:[%s2729_s14 + $0x90] sm:$0xff] }
 0x291   : > { %1969 = vpow2.f32 %v1135_v18  ;;  %v1072_v16 = vsub.f32 0.0, %v887_v37  ;;  %v890_v25 = vpop.f32.mrb[4].mxu1  ;;  %v3147_v37 = vld [vmem:[%s2729_s14 + $0xb8] sm:$0xff] }
 0x292   : > { %v1137_v32 = vmul.f32 1.442695, %v1071_v33  ;;  %v891_v20 = vadd.f32 %v890_v25, %v3036_v29  ;;  %v892_v31 = vpop.f32.mrb[5].mxu1  ;;  %3866 = vst [vmem:[#allocation52_spill] sm:$0xff] %v3147_v37  ;;  %v3157_v25 = vld [vmem:[%s2729_s14 + $0xc8] sm:$0xff]  ;;  %v3193_v37 = vld [vmem:[%s2729_s14 + $0xf8] sm:$0xff] }
 0x293   : > { %v1139_v21 = vmul.f32 1.442695, %v1072_v16  ;;  %v893_v36 = vadd.f32 %v892_v31, %v3038_v22  ;;  %v3154_v16 = vld [vmem:[%s2729_s14 + $0xb0] sm:$0xff]  ;;  %3867 = vst [vmem:[#allocation53_spill] sm:$0xff] %v3157_v25  ;;  %v3203_v25 = vld [vmem:[%s2729_s14 + $0x108] sm:$0xff] }
 0x294   : > { %1971 = vpow2.f32 %v1137_v32  ;;  %v1073_v18 = vsub.f32 0.0, %v891_v20  ;;  %v3178_v32 = vld [vmem:[%s2729_s14 + $0xe8] sm:$0xff]  ;;  %3872 = vst [vmem:[#allocation58_spill] sm:$0xff] %v3203_v25  ;;  %v3231_v25 = vld [vmem:[%s2729_s14 + $0x120] sm:$0xff] }
 0x295   : > { %1973 = vpow2.f32 %v1139_v21  ;;  %v1074_v33 = vsub.f32 0.0, %v893_v36  ;;  %v896_v24 = vpop.f32.mrb[6].mxu1  ;;  %3870 = vst [vmem:[#allocation56_spill] sm:$0xff] %v3178_v32  ;;  %v3224_v32 = vld [vmem:[%s2729_s14 + $0x110] sm:$0xff]  ;;  %3876 = vst [vmem:[#allocation62_spill] sm:$0xff] %v3231_v25 }
 0x296   : > { %v1141_v31 = vmul.f32 1.442695, %v1073_v18  ;;  %v897_v23 = vadd.f32 %v896_v24, %v3036_v29  ;;  %v898_v46 = vpop.f32.mrb[7].mxu1 }
 0x297   : > { %v1143_v20 = vmul.f32 1.442695, %v1074_v33  ;;  %v899_v51 = vadd.f32 %v898_v46, %v3038_v22 }
 0x298   : > { %1975 = vpow2.f32 %v1141_v31  ;;  %v1075_v36 = vsub.f32 0.0, %v897_v23  ;;  %v3200_v23 = vld [vmem:[%s2729_s14 + $0xf0] sm:$0xff] }
 0x299   : > { %1977 = vpow2.f32 %v1143_v20  ;;  %v1076_v46 = vsub.f32 0.0, %v899_v51  ;;  %v902_v52 = vpop.f32.mrb[8].mxu1  ;;  %v3209_v20 = vld [vmem:[%s2729_s14 + $0x100] sm:$0xff] }
 0x29a   : > { %v1968_v18 = vpop.eup %1967  ;;  %v1145_v21 = vmul.f32 1.442695, %v1075_v36  ;;  %v903_v33 = vadd.f32 %v902_v52, %v3036_v29  ;;  %v904_v44 = vpop.f32.mrb[9].mxu1  ;;  %3873 = vst [vmem:[#allocation59_spill] sm:$0xff] %v3209_v20 }
 0x29b   : > { %v1970_v56 = vpop.eup %1969  ;;  %v1261_v24 = vadd.f32 1.0, %v1968_v18  ;;  %v1147_v14 = vmul.f32 1.442695, %v1076_v46  ;;  %v905_v31 = vadd.f32 %v904_v44, %v3038_v22 }
 0x29c   : > { %v1262_v58 = vadd.f32 1.0, %v1970_v56  ;;  %1979 = vpow2.f32 %v1145_v21  ;;  %v1077_v36 = vsub.f32 0.0, %v903_v33  ;;  %v3227_v56 = vld [vmem:[%s2729_s14 + $0x128] sm:$0xff] }
 0x29d   : > { %1981 = vrcp.f32 %v1261_v24  ;;  %v1078_v18 = vsub.f32 0.0, %v905_v31  ;;  %v908_v46 = vpop.f32.mrb[10].mxu1  ;;  %3875 = vst [vmem:[#allocation61_spill] sm:$0xff] %v3227_v56  ;;  %v3253_v56 = vld [vmem:[%s2729_s14 + $0x140] sm:$0xff] }
 0x29e   : > { %v1972_v59 = vpop.eup %1971  ;;  %1983 = vrcp.f32 %v1262_v58  ;;  %v1149_v21 = vmul.f32 1.442695, %v1077_v36  ;;  %v909_v33 = vadd.f32 %v908_v46, %v3036_v29  ;;  %v910_v52 = vpop.f32.mrb[11].mxu1  ;;  %3878 = vst [vmem:[#allocation64_spill] sm:$0xff] %v3253_v56 }
 0x29f   : > { %v1974_v51 = vpop.eup %1973  ;;  %v1263_v24 = vadd.f32 1.0, %v1972_v59  ;;  %1985 = vpow2.f32 %v1147_v14  ;;  %v1151_v31 = vmul.f32 1.442695, %v1078_v18  ;;  %v911_v44 = vadd.f32 %v910_v52, %v3038_v22  ;;  %v3241_v59 = vld [vmem:[%s2729_s14 + $0x138] sm:$0xff] }
 0x2a0   : > { %v1264_v20 = vadd.f32 1.0, %v1974_v51  ;;  %1987 = vpow2.f32 %v1149_v21  ;;  %v1079_v58 = vsub.f32 0.0, %v909_v33  ;;  %v3249_v51 = vld [vmem:[%s2729_s14 + $0x148] sm:$0xff] }
 0x2a1   : > { %1989 = vrcp.f32 %v1263_v24  ;;  %v1080_v14 = vsub.f32 0.0, %v911_v44  ;;  %v914_v18 = vpop.f32.mrb[12].mxu1  ;;  %3877 = vst [vmem:[#allocation63_spill] sm:$0xff] %v3249_v51 }
 0x2a2   : > { %v1976_v63 = vpop.eup %1975  ;;  %1991 = vrcp.f32 %v1264_v20  ;;  %v1153_v21 = vmul.f32 1.442695, %v1079_v58  ;;  %v915_v33 = vadd.f32 %v914_v18, %v3036_v29  ;;  %v916_v36 = vpop.f32.mrb[13].mxu1 }
 0x2a3   : > { %v1978_v46 = vpop.eup %1977  ;;  %v1265_v24 = vadd.f32 1.0, %v1976_v63  ;;  %1993 = vpow2.f32 %v1151_v31  ;;  %v1155_v44 = vmul.f32 1.442695, %v1080_v14  ;;  %v917_v3 = vadd.f32 %v916_v36, %v3038_v22 }
 0x2a4   : > { %v1266_v25 = vadd.f32 1.0, %v1978_v46  ;;  %1995 = vpow2.f32 %v1153_v21  ;;  %v1081_v20 = vsub.f32 0.0, %v915_v33  ;;  %v3881_v36 = vsub.f32 %v2764_v50, %v3044_v30 }
 0x2a5   : > { %1997 = vrcp.f32 %v1265_v24  ;;  %v1082_v63 = vsub.f32 0.0, %v917_v3  ;;  %v920_v31 = vpop.f32.mrb[14].mxu1 }
 0x2a6   : > { %v1980_v14 = vpop.eup %1979  ;;  %1999 = vrcp.f32 %v1266_v25  ;;  %v1157_v46 = vmul.f32 1.442695, %v1081_v20  ;;  %v921_v21 = vadd.f32 %v920_v31, %v3036_v29  ;;  %v922_v33 = vpop.f32.mrb[15].mxu1 }
 0x2a7   : > { %v1982_v52 = vpop.eup %1981  ;;  %v1267_v58 = vadd.f32 1.0, %v1980_v14  ;;  %2001 = vpow2.f32 %v1155_v44  ;;  %v1159_v18 = vmul.f32 1.442695, %v1082_v63  ;;  %v923_v3 = vadd.f32 %v922_v33, %v3038_v22  ;;  %v3280_v14 = vld [vmem:[%s2729_s14 + $0x168] sm:$0xff]  ;;  %v3883_v44 = vld [vmem:[#allocation38_spill] sm:$0xff] }
 0x2a8   : > { %v1984_v24 = vpop.eup %1983  ;;  %v1453_v25 = vmul.f32 %v1982_v52, %v3881_v36  ;;  %2003 = vpow2.f32 %v1157_v46  ;;  %v1083_v20 = vsub.f32 0.0, %v921_v21  ;;  %3882 = vst [vmem:[#allocation67_spill] sm:$0xff] %v3280_v14  ;;  %v3884_v63 = vsub.f32 %v2747_v12, %v3883_v44 }
 0x2a9   : > { %v1986_v8 = vpop.eup %1985  ;;  %2005 = vrcp.f32 %v1267_v58  ;;  %v1084_v56 = vsub.f32 0.0, %v923_v3  ;;  %v926_v51 = vpop.f32.mrb[16].mxu1  ;;  %v3308_v3 = vld [vmem:[%s2729_s14 + $0x178] sm:$0xff] }
 0x2aa   : > { %v1454_v33 = vmul.f32 %v1984_v24, %v3884_v63  ;;  %v1988_v4 = vpop.eup %1987  ;;  %v1517_v50 = vadd.f32 %v1453_v25, %v3044_v30  ;;  %v1268_v52 = vadd.f32 1.0, %v1986_v8  ;;  %2007 = vpow2.f32 %v1159_v18  ;;  %v928_v46 = vpop.f32.mrb[17].mxu1  ;;  %v3886_v8 = vld [vmem:[#allocation40_spill] sm:$0xff] }
 0x2ab   : > { %v1161_v36 = vmul.f32 1.442695, %v1083_v20  ;;  %v1990_v21 = vpop.eup %1989  ;;  %v1269_v48 = vadd.f32 1.0, %v1988_v4  ;;  %v1163_v13 = vmul.f32 1.442695, %v1084_v56  ;;  %v927_v12 = vadd.f32 %v926_v51, %v3036_v29  ;;  %v3888_v51 = vld [vmem:[#allocation36_spill] sm:$0xff] }
 0x2ac   : > { %v1518_v31 = vadd.f32 %v1454_v33, %v3883_v44  ;;  %v1992_v58 = vpop.eup %1991  ;;  %1581 = vst [vmem:[%s3294_s2] sm:$0xff] %v1517_v50  ;;  %v3887_v30 = vsub.f32 %v2772_v2, %v3886_v8  ;;  %2009 = vrcp.f32 %v1268_v52  ;;  %v929_v4 = vadd.f32 %v928_v46, %v3038_v22  ;;  %v3889_v20 = vld [vmem:[#allocation16_spill] sm:$0xff]  ;;  %v3890_v44 = vld [vmem:[#allocation39_spill] sm:$0xff] }
 0x2ad   : > { %v1994_v56 = vpop.eup %1993  ;;  %v3891_v63 = vsub.f32 %v3889_v20, %v3890_v44  ;;  %2011 = vrcp.f32 %v1269_v48  ;;  %v1085_v24 = vsub.f32 0.0, %v927_v12  ;;  %v932_v50 = vpop.f32.mrb[18].mxu1  ;;  %v3892_v12 = vsub.f32 %v2780_v10, %v3058_v40 }
 0x2ae   : > { %v1455_v18 = vmul.f32 %v1990_v21, %v3887_v30  ;;  %1582 = vst [vmem:[%s3294_s2 + $0x8] sm:$0xff] %v1518_v31  ;;  %v1996_v14 = vpop.eup %1995  ;;  %v1270_v52 = vadd.f32 1.0, %v1994_v56  ;;  %2013 = vpow2.f32 %v1161_v36  ;;  %v1086_v46 = vsub.f32 0.0, %v929_v4  ;;  %v934_v21 = vpop.f32.mrb[19].mxu1  ;;  %v3894_v56 = vld [vmem:[#allocation17_spill] sm:$0xff] }
 0x2af   : > { %v1456_v33 = vmul.f32 %v1992_v58, %v3891_v63  ;;  %v1998_v30 = vpop.eup %1997  ;;  %v1271_v25 = vadd.f32 1.0, %v1996_v14  ;;  %2015 = vpow2.f32 %v1163_v13  ;;  %v1165_v58 = vmul.f32 1.442695, %v1085_v24 }
 0x2b0   : > { %v1519_v2 = vadd.f32 %v1455_v18, %v3886_v8  ;;  %v2000_v48 = vpop.eup %1999  ;;  %v1457_v20 = vmul.f32 %v1998_v30, %v3892_v12  ;;  %2017 = vrcp.f32 %v1270_v52  ;;  %v1167_v63 = vmul.f32 1.442695, %v1086_v46  ;;  %v3893_v18 = vld [vmem:[#allocation37_spill] sm:$0xff] }
 0x2b1   : > { %v1520_v31 = vadd.f32 %v1456_v33, %v3890_v44  ;;  %v933_v8 = vadd.f32 %v932_v50, %v3036_v29  ;;  %v2002_v36 = vpop.eup %2001  ;;  %v1436_v4 = vsub.f32 %v3893_v18, %v3308_v3  ;;  %v3895_v44 = vld [vmem:[#allocation41_spill] sm:$0xff]  ;;  %2019 = vrcp.f32 %v1271_v25  ;;  %v938_v33 = vpop.f32.mrb[20].mxu1  ;;  %v2239_v3 = vld [vmem:[%s2729_s14 + $0x178] sm:$0xff] }
 0x2b2   : > { %1583 = vst [vmem:[%s3294_s2 + $0x10] sm:$0xff] %v1519_v2  ;;  %v3896_v14 = vsub.f32 %v3894_v56, %v3895_v44  ;;  %v935_v24 = vadd.f32 %v934_v21, %v3038_v22  ;;  %v2004_v10 = vpop.eup %2003  ;;  %v1521_v2 = vadd.f32 %v1457_v20, %v3058_v40  ;;  %v1272_v52 = vadd.f32 1.0, %v2002_v36  ;;  %v940_v46 = vpop.f32.mrb[21].mxu1 }
 0x2b3   : > { %1584 = vst [vmem:[%s3294_s2 + $0x18] sm:$0xff] %v1520_v31  ;;  %2021 = vpow2.f32 %v1165_v58  ;;  %v1087_v50 = vsub.f32 0.0, %v933_v8  ;;  %v2006_v30 = vpop.eup %2005  ;;  %v1273_v12 = vadd.f32 1.0, %v2004_v10  ;;  %v3897_v25 = vsub.f32 %v2788_v19, %v3070_v26 }
 0x2b4   : > { %v1458_v13 = vmul.f32 %v2000_v48, %v3896_v14  ;;  %2023 = vpow2.f32 %v1167_v63  ;;  %v1088_v56 = vsub.f32 0.0, %v935_v24  ;;  %v2008_v48 = vpop.eup %2007  ;;  %1585 = vst [vmem:[%s3294_s2 + $0x20] sm:$0xff] %v1521_v2  ;;  %v939_v40 = vadd.f32 %v938_v33, %v3036_v29  ;;  %v3898_v33 = vld [vmem:[#allocation42_spill] sm:$0xff] }
 0x2b5   : > { %v1459_v21 = vmul.f32 %v2006_v30, %v3897_v25  ;;  %2025 = vrcp.f32 %v1272_v52  ;;  %v1169_v14 = vmul.f32 1.442695, %v1087_v50  ;;  %v1274_v58 = vadd.f32 1.0, %v2008_v48  ;;  %v944_v63 = vpop.f32.mrb[22].mxu1 }
 0x2b6   : > { %v1522_v31 = vadd.f32 %v1458_v13, %v3895_v44  ;;  %2027 = vrcp.f32 %v1273_v12  ;;  %v1171_v20 = vmul.f32 1.442695, %v1088_v56  ;;  %v941_v8 = vadd.f32 %v940_v46, %v3038_v22  ;;  %v2010_v36 = vpop.eup %2009  ;;  %v946_v24 = vpop.f32.mrb[23].mxu1  ;;  %v3340_v46 = vld [vmem:[%s2729_s14 + $0x170] sm:$0xff] }
 0x2b7   : > { %v1523_v44 = vadd.f32 %v1459_v21, %v3070_v26  ;;  %2029 = vpow2.f32 %v1169_v14  ;;  %v1089_v13 = vsub.f32 0.0, %v939_v40  ;;  %v945_v19 = vadd.f32 %v944_v63, %v3036_v29  ;;  %v2012_v10 = vpop.eup %2011 }
 0x2b8   : > { %1586 = vst [vmem:[%s3294_s2 + $0x28] sm:$0xff] %v1522_v31  ;;  %v3899_v2 = vsub.f32 %v2783_v15, %v3898_v33  ;;  %2031 = vrcp.f32 %v1274_v58  ;;  %v1090_v50 = vsub.f32 0.0, %v941_v8  ;;  %v947_v30 = vadd.f32 %v946_v24, %v3038_v22  ;;  %v2014_v31 = vpop.eup %2013  ;;  %v3349_v24 = vld [vmem:[%s2721_s12 + $0x170] sm:$0xff] }
 0x2b9   : > { %1587 = vst [vmem:[%s3294_s2 + $0x30] sm:$0xff] %v1523_v44  ;;  %v3900_v26 = vsub.f32 %v2796_v27, %v3080_v17  ;;  %2033 = vpow2.f32 %v1171_v20  ;;  %v1173_v56 = vmul.f32 1.442695, %v1089_v13  ;;  %v1091_v48 = vsub.f32 0.0, %v945_v19  ;;  %v2016_v25 = vpop.eup %2015  ;;  %v950_v58 = vpop.f32.mrb[24].mxu1  ;;  %v3901_v19 = vld [vmem:[#allocation18_spill] sm:$0xff] }
 0x2ba   : > { %v1460_v52 = vmul.f32 %v2010_v36, %v3899_v2  ;;  %v1275_v21 = vadd.f32 1.0, %v2014_v31  ;;  %v1175_v14 = vmul.f32 1.442695, %v1090_v50  ;;  %v1092_v40 = vsub.f32 0.0, %v947_v30  ;;  %v2018_v8 = vpop.eup %2017  ;;  %v952_v44 = vpop.f32.mrb[25].mxu1 }
 0x2bb   : > { %v1461_v12 = vmul.f32 %v2012_v10, %v3900_v26  ;;  %v1276_v36 = vadd.f32 1.0, %v2016_v25  ;;  %2035 = vpow2.f32 %v1173_v56  ;;  %v1177_v27 = vmul.f32 1.442695, %v1091_v48  ;;  %v2020_v20 = vpop.eup %2019  ;;  %v3902_v10 = vld [vmem:[#allocation43_spill] sm:$0xff] }
 0x2bc   : > { %v1524_v15 = vadd.f32 %v1460_v52, %v3898_v33  ;;  %v1435_v13 = vsub.f32 %v3349_v24, %v3340_v46  ;;  %v3903_v33 = vsub.f32 %v3901_v19, %v3902_v10  ;;  %2037 = vrcp.f32 %v1275_v21  ;;  %v3907_v19 = vld [vmem:[#allocation44_spill] sm:$0xff] }
 0x2bd   : > { %v1525_v63 = vadd.f32 %v1461_v12, %v3080_v17  ;;  %v951_v52 = vadd.f32 %v950_v58, %v3036_v29  ;;  %v2022_v50 = vpop.eup %2021  ;;  %v3904_v17 = vld [vmem:[#allocation45_spill] sm:$0xff]  ;;  %2039 = vrcp.f32 %v1276_v36  ;;  %v1179_v26 = vmul.f32 1.442695, %v1092_v40  ;;  %v956_v21 = vpop.f32.mrb[26].mxu1  ;;  %v3906_v40 = vld [vmem:[#allocation19_spill] sm:$0xff] }
 0x2be   : > { %1588 = vst [vmem:[%s3294_s2 + $0x38] sm:$0xff] %v1524_v15  ;;  %v1462_v2 = vmul.f32 %v2018_v8, %v3903_v33  ;;  %v3905_v30 = vsub.f32 %v2804_v35, %v3904_v17  ;;  %v953_v12 = vadd.f32 %v952_v44, %v3038_v22  ;;  %v2024_v56 = vpop.eup %2023  ;;  %v1277_v25 = vadd.f32 1.0, %v2022_v50 }
 0x2bf   : > { %1589 = vst [vmem:[%s3294_s2 + $0x40] sm:$0xff] %v1525_v63  ;;  %2041 = vpow2.f32 %v1175_v14  ;;  %v1093_v15 = vsub.f32 0.0, %v951_v52  ;;  %v2026_v58 = vpop.eup %2025  ;;  %v1278_v63 = vadd.f32 1.0, %v2024_v56  ;;  %v3908_v44 = vsub.f32 %v3906_v40, %v3907_v19 }
 0x2c0   : > { %v1463_v31 = vmul.f32 %v2020_v20, %v3905_v30  ;;  %v1526_v48 = vadd.f32 %v1462_v2, %v3902_v10  ;;  %2043 = vpow2.f32 %v1177_v27  ;;  %v1094_v35 = vsub.f32 0.0, %v953_v12  ;;  %v958_v20 = vpop.f32.mrb[27].mxu1  ;;  %v2028_v36 = vpop.eup %2027 }
 0x2c1   : > { %v1464_v33 = vmul.f32 %v2026_v58, %v3908_v44  ;;  %2045 = vrcp.f32 %v1277_v25  ;;  %v1181_v10 = vmul.f32 1.442695, %v1093_v15  ;;  %v957_v14 = vadd.f32 %v956_v21, %v3036_v29  ;;  %v2030_v2 = vpop.eup %2029  ;;  %v3377_v15 = vld [vmem:[%s2729_s14 + $0x188] sm:$0xff]  ;;  %v3911_v58 = vld [vmem:[#allocation46_spill] sm:$0xff] }
 0x2c2   : > { %v1527_v8 = vadd.f32 %v1463_v31, %v3904_v17  ;;  %1590 = vst [vmem:[%s3294_s2 + $0x48] sm:$0xff] %v1526_v48  ;;  %v3909_v52 = vsub.f32 %v2812_v41, %v3102_v6  ;;  %2047 = vrcp.f32 %v1278_v63  ;;  %v1183_v27 = vmul.f32 1.442695, %v1094_v35  ;;  %v2032_v30 = vpop.eup %2031  ;;  %v962_v48 = vpop.f32.mrb[28].mxu1  ;;  %v3910_v41 = vld [vmem:[#allocation20_spill] sm:$0xff] }
 0x2c3   : > { %v959_v17 = vadd.f32 %v958_v20, %v3038_v22  ;;  %v1528_v31 = vadd.f32 %v1464_v33, %v3907_v19  ;;  %v1279_v12 = vadd.f32 1.0, %v2030_v2  ;;  %2049 = vpow2.f32 %v1179_v26  ;;  %v2034_v25 = vpop.eup %2033  ;;  %v964_v20 = vpop.f32.mrb[29].mxu1  ;;  %v3389_v2 = vld [vmem:[%s2721_s12 + $0x188] sm:$0xff] }
 0x2c4   : > { %1591 = vst [vmem:[%s3294_s2 + $0x50] sm:$0xff] %v1527_v8  ;;  %v1465_v50 = vmul.f32 %v2028_v36, %v3909_v52  ;;  %v1095_v56 = vsub.f32 0.0, %v957_v14  ;;  %v3912_v8 = vsub.f32 %v3910_v41, %v3911_v58  ;;  %2051 = vpow2.f32 %v1181_v10 }
 0x2c5   : > { %v1096_v35 = vsub.f32 0.0, %v959_v17  ;;  %1592 = vst [vmem:[%s3294_s2 + $0x58] sm:$0xff] %v1528_v31  ;;  %2053 = vrcp.f32 %v1279_v12  ;;  %v1280_v36 = vadd.f32 1.0, %v2034_v25  ;;  %v963_v40 = vadd.f32 %v962_v48, %v3036_v29  ;;  %v2036_v19 = vpop.eup %2035  ;;  %v968_v17 = vpop.f32.mrb[30].mxu1 }
 0x2c6   : > { %v1529_v21 = vadd.f32 %v1465_v50, %v3102_v6  ;;  %v1466_v63 = vmul.f32 %v2032_v30, %v3912_v8  ;;  %v1185_v26 = vmul.f32 1.442695, %v1095_v56  ;;  %2055 = vpow2.f32 %v1183_v27  ;;  %v2038_v14 = vpop.eup %2037  ;;  %v970_v48 = vpop.f32.mrb[31].mxu1 }
 0x2c7   : > { %v1187_v6 = vmul.f32 1.442695, %v1096_v35  ;;  %v965_v33 = vadd.f32 %v964_v20, %v3038_v22  ;;  %v1438_v10 = vsub.f32 %v3389_v2, %v3377_v15  ;;  %2057 = vrcp.f32 %v1280_v36  ;;  %v2040_v30 = vpop.eup %2039 }
 0x2c8   : > { %1593 = vst [vmem:[%s3294_s2 + $0x60] sm:$0xff] %v1529_v21  ;;  %v1530_v44 = vadd.f32 %v1466_v63, %v3911_v58  ;;  %v1281_v52 = vadd.f32 1.0, %v2036_v19  ;;  %v1097_v50 = vsub.f32 0.0, %v963_v40  ;;  %v3913_v31 = vsub.f32 %v2820_v43, %v3112_v34  ;;  %v3914_v21 = vld [vmem:[#allocation47_spill] sm:$0xff] }
 0x2c9   : > { %2059 = vpow2.f32 %v1185_v26  ;;  %v1098_v27 = vsub.f32 0.0, %v965_v33  ;;  %v969_v56 = vadd.f32 %v968_v17, %v3036_v29  ;;  %v2042_v25 = vpop.eup %2041  ;;  %v3915_v41 = vsub.f32 %v2815_v42, %v3914_v21  ;;  %v974_v42 = vpop.f32.mrb[32].mxu1 }
 0x2ca   : > { %1594 = vst [vmem:[%s3294_s2 + $0x68] sm:$0xff] %v1530_v44  ;;  %v1467_v12 = vmul.f32 %v2038_v14, %v3913_v31  ;;  %2061 = vrcp.f32 %v1281_v52  ;;  %v1189_v8 = vmul.f32 1.442695, %v1097_v50  ;;  %v971_v63 = vadd.f32 %v970_v48, %v3038_v22  ;;  %v2044_v35 = vpop.eup %2043  ;;  %v3916_v14 = vld [vmem:[#allocation49_spill] sm:$0xff] }
 0x2cb   : > { %v1468_v58 = vmul.f32 %v2040_v30, %v3915_v41  ;;  %v1282_v43 = vadd.f32 1.0, %v2042_v25  ;;  %2063 = vpow2.f32 %v1187_v6  ;;  %v1191_v36 = vmul.f32 1.442695, %v1098_v27  ;;  %v2046_v26 = vpop.eup %2045  ;;  %v976_v6 = vpop.f32.mrb[33].mxu1  ;;  %v3918_v31 = vld [vmem:[#allocation21_spill] sm:$0xff] }
 0x2cc   : > { %v1531_v20 = vadd.f32 %v1467_v12, %v3112_v34  ;;  %v1283_v19 = vadd.f32 1.0, %v2044_v35  ;;  %2065 = vpow2.f32 %v1189_v8  ;;  %v1099_v44 = vsub.f32 0.0, %v969_v56  ;;  %v2048_v33 = vpop.eup %2047  ;;  %v3919_v12 = vld [vmem:[#allocation48_spill] sm:$0xff] }
 0x2cd   : > { %v1532_v40 = vadd.f32 %v1468_v58, %v3914_v21  ;;  %v3917_v52 = vsub.f32 %v2828_v45, %v3916_v14  ;;  %2067 = vrcp.f32 %v1282_v43  ;;  %v1100_v17 = vsub.f32 0.0, %v971_v63  ;;  %v2050_v30 = vpop.eup %2049  ;;  %v980_v43 = vpop.f32.mrb[34].mxu1 }
 0x2ce   : > { %1595 = vst [vmem:[%s3294_s2 + $0x70] sm:$0xff] %v1531_v20  ;;  %v975_v34 = vadd.f32 %v974_v42, %v3036_v29  ;;  %v3920_v27 = vsub.f32 %v3918_v31, %v3919_v12  ;;  %2069 = vrcp.f32 %v1283_v19  ;;  %v1193_v56 = vmul.f32 1.442695, %v1099_v44  ;;  %v2052_v21 = vpop.eup %2051 }
 0x2cf   : > { %v1469_v50 = vmul.f32 %v2046_v26, %v3917_v52  ;;  %1596 = vst [vmem:[%s3294_s2 + $0x78] sm:$0xff] %v1532_v40  ;;  %v977_v25 = vadd.f32 %v976_v6, %v3038_v22  ;;  %v1284_v41 = vadd.f32 1.0, %v2050_v30  ;;  %2071 = vpow2.f32 %v1191_v36  ;;  %v2054_v8 = vpop.eup %2053  ;;  %v982_v36 = vpop.f32.mrb[35].mxu1  ;;  %v3922_v6 = vld [vmem:[#allocation22_spill] sm:$0xff] }
 0x2d0   : > { %v1470_v48 = vmul.f32 %v2048_v33, %v3920_v27  ;;  %v1195_v58 = vmul.f32 1.442695, %v1100_v17  ;;  %v1285_v35 = vadd.f32 1.0, %v2052_v21  ;;  %2073 = vpow2.f32 %v1193_v56  ;;  %v2056_v26 = vpop.eup %2055 }
 0x2d1   : > { %v1533_v45 = vadd.f32 %v1469_v50, %v3916_v14  ;;  %v1101_v20 = vsub.f32 0.0, %v975_v34  ;;  %v3921_v40 = vsub.f32 %v2836_v47, %v3133_v28  ;;  %2075 = vrcp.f32 %v1284_v41  ;;  %v2058_v33 = vpop.eup %2057  ;;  %v3923_v47 = vld [vmem:[#allocation50_spill] sm:$0xff]  ;;  %v986_v21 = vpop.f32.mrb[36].mxu1  ;;  %v3428_v41 = vld [vmem:[%s2729_s14 + $0x180] sm:$0xff] }
 0x2d2   : > { %v1534_v63 = vadd.f32 %v1470_v48, %v3919_v12  ;;  %v1102_v44 = vsub.f32 0.0, %v977_v25  ;;  %v981_v42 = vadd.f32 %v980_v43, %v3036_v29  ;;  %2077 = vrcp.f32 %v1285_v35  ;;  %v988_v35 = vpop.f32.mrb[37].mxu1 }
 0x2d3   : > { %1597 = vst [vmem:[%s3294_s2 + $0x80] sm:$0xff] %v1533_v45  ;;  %v1471_v19 = vmul.f32 %v2054_v8, %v3921_v40  ;;  %v1286_v14 = vadd.f32 1.0, %v2056_v26  ;;  %v1197_v52 = vmul.f32 1.442695, %v1101_v20  ;;  %v983_v50 = vadd.f32 %v982_v36, %v3038_v22  ;;  %v2060_v17 = vpop.eup %2059 }
 0x2d4   : > { %1598 = vst [vmem:[%s3294_s2 + $0x88] sm:$0xff] %v1534_v63  ;;  %v3924_v30 = vsub.f32 %v3922_v6, %v3923_v47  ;;  %2079 = vpow2.f32 %v1195_v58  ;;  %v1199_v12 = vmul.f32 1.442695, %v1102_v44  ;;  %v2062_v27 = vpop.eup %2061  ;;  %v1287_v48 = vadd.f32 1.0, %v2060_v17 }
 0x2d5   : > { %v1535_v34 = vadd.f32 %v1471_v19, %v3133_v28  ;;  %2081 = vrcp.f32 %v1286_v14  ;;  %v1103_v56 = vsub.f32 0.0, %v981_v42  ;;  %v1104_v25 = vsub.f32 0.0, %v983_v50  ;;  %v2064_v45 = vpop.eup %2063  ;;  %v3927_v50 = vld [vmem:[#allocation51_spill] sm:$0xff] }
 0x2d6   : > { %v1472_v31 = vmul.f32 %v2058_v33, %v3924_v30  ;;  %v3925_v28 = vsub.f32 %v2844_v49, %v3144_v39  ;;  %2083 = vpow2.f32 %v1197_v52  ;;  %v987_v58 = vadd.f32 %v986_v21, %v3036_v29  ;;  %v2066_v20 = vpop.eup %2065  ;;  %v3439_v33 = vld [vmem:[%s2721_s12 + $0x180] sm:$0xff]  ;;  %v3926_v52 = vld [vmem:[#allocation23_spill] sm:$0xff] }
 0x2d7   : > { %1599 = vst [vmem:[%s3294_s2 + $0x90] sm:$0xff] %v1535_v34  ;;  %2085 = vrcp.f32 %v1287_v48  ;;  %v1288_v43 = vadd.f32 1.0, %v2064_v45  ;;  %v1201_v26 = vmul.f32 1.442695, %v1103_v56  ;;  %v1203_v40 = vmul.f32 1.442695, %v1104_v25  ;;  %v2068_v19 = vpop.eup %2067 }
 0x2d8   : > { %v1536_v8 = vadd.f32 %v1472_v31, %v3923_v47  ;;  %v1473_v63 = vmul.f32 %v2062_v27, %v3925_v28  ;;  %v1289_v42 = vadd.f32 1.0, %v2066_v20  ;;  %2087 = vpow2.f32 %v1199_v12  ;;  %v2070_v49 = vpop.eup %2069  ;;  %v992_v47 = vpop.f32.mrb[38].mxu1  ;;  %v3931_v20 = vld [vmem:[#allocation52_spill] sm:$0xff] }
 0x2d9   : > { %v1105_v36 = vsub.f32 0.0, %v987_v58  ;;  %v1437_v14 = vsub.f32 %v3439_v33, %v3428_v41  ;;  %v3928_v17 = vsub.f32 %v3926_v52, %v3927_v50  ;;  %2089 = vrcp.f32 %v1288_v43  ;;  %v2072_v30 = vpop.eup %2071  ;;  %v994_v48 = vpop.f32.mrb[39].mxu1 }
 0x2da   : > { %1600 = vst [vmem:[%s3294_s2 + $0x98] sm:$0xff] %v1536_v8  ;;  %v1537_v44 = vadd.f32 %v1473_v63, %v3144_v39  ;;  %v989_v6 = vadd.f32 %v988_v35, %v3038_v22  ;;  %v3929_v39 = vsub.f32 %v2852_v53, %v3154_v16  ;;  %2091 = vrcp.f32 %v1289_v42  ;;  %v2074_v56 = vpop.eup %2073  ;;  %v3930_v35 = vld [vmem:[#allocation24_spill] sm:$0xff] }
 0x2db   : > { %v1474_v34 = vmul.f32 %v2068_v19, %v3928_v17  ;;  %v1205_v12 = vmul.f32 1.442695, %v1105_v36  ;;  %v993_v27 = vadd.f32 %v992_v47, %v3036_v29  ;;  %v1290_v21 = vadd.f32 1.0, %v2072_v30  ;;  %v2076_v8 = vpop.eup %2075  ;;  %v998_v36 = vpop.f32.mrb[40].mxu1 }
 0x2dc   : > { %1601 = vst [vmem:[%s3294_s2 + $0xa0] sm:$0xff] %v1537_v44  ;;  %v1475_v31 = vmul.f32 %v2070_v49, %v3929_v39  ;;  %2093 = vpow2.f32 %v1201_v26  ;;  %v1106_v45 = vsub.f32 0.0, %v989_v6  ;;  %v1291_v63 = vadd.f32 1.0, %v2074_v56  ;;  %v2078_v58 = vpop.eup %2077 }
 0x2dd   : > { %v1538_v25 = vadd.f32 %v1474_v34, %v3927_v50  ;;  %2095 = vpow2.f32 %v1203_v40  ;;  %v1107_v53 = vsub.f32 0.0, %v993_v27  ;;  %v3932_v43 = vsub.f32 %v3930_v35, %v3931_v20  ;;  %v1000_v50 = vpop.f32.mrb[41].mxu1 }
 0x2de   : > { %v1539_v28 = vadd.f32 %v1475_v31, %v3154_v16  ;;  %2097 = vrcp.f32 %v1290_v21  ;;  %v1207_v44 = vmul.f32 1.442695, %v1106_v45  ;;  %v995_v42 = vadd.f32 %v994_v48, %v3038_v22  ;;  %v2080_v49 = vpop.eup %2079  ;;  %v3934_v31 = vld [vmem:[#allocation53_spill] sm:$0xff] }
 0x2df   : > { %1602 = vst [vmem:[%s3294_s2 + $0xa8] sm:$0xff] %v1538_v25  ;;  %v1476_v19 = vmul.f32 %v2076_v8, %v3932_v43  ;;  %v3933_v26 = vsub.f32 %v2860_v55, %v3164_v38  ;;  %2099 = vrcp.f32 %v1291_v63  ;;  %v1209_v40 = vmul.f32 1.442695, %v1107_v53  ;;  %v2082_v17 = vpop.eup %2081  ;;  %v1004_v8 = vpop.f32.mrb[42].mxu1 }
 0x2e0   : > { %1603 = vst [vmem:[%s3294_s2 + $0xb0] sm:$0xff] %v1539_v28  ;;  %v999_v52 = vadd.f32 %v998_v36, %v3036_v29  ;;  %v1292_v6 = vadd.f32 1.0, %v2080_v49  ;;  %2101 = vpow2.f32 %v1205_v12  ;;  %v1108_v47 = vsub.f32 0.0, %v995_v42  ;;  %v2084_v30 = vpop.eup %2083  ;;  %v3938_v36 = vld [vmem:[#allocation25_spill] sm:$0xff]  ;;  %v3939_v49 = vld [vmem:[#allocation54_spill] sm:$0xff] }
 0x2e1   : > { %v1477_v16 = vmul.f32 %v2078_v58, %v3933_v26  ;;  %v1540_v34 = vadd.f32 %v1476_v19, %v3931_v20  ;;  %v3935_v55 = vsub.f32 %v2855_v54, %v3934_v31  ;;  %2103 = vpow2.f32 %v1207_v44  ;;  %v2086_v56 = vpop.eup %2085  ;;  %v1006_v58 = vpop.f32.mrb[43].mxu1 }
 0x2e2   : > { %v1109_v48 = vsub.f32 0.0, %v999_v52  ;;  %2105 = vrcp.f32 %v1292_v6  ;;  %v1293_v25 = vadd.f32 1.0, %v2084_v30  ;;  %v1211_v21 = vmul.f32 1.442695, %v1108_v47  ;;  %v2088_v12 = vpop.eup %2087  ;;  %v3941_v52 = vld [vmem:[#allocation27_spill] sm:$0xff]  ;;  %v1010_v30 = vpop.f32.mrb[44].mxu1 }
 0x2e3   : > { %v1541_v39 = vadd.f32 %v1477_v16, %v3164_v38  ;;  %v1478_v27 = vmul.f32 %v2082_v17, %v3935_v55  ;;  %1604 = vst [vmem:[%s3294_s2 + $0xb8] sm:$0xff] %v1540_v34  ;;  %v1001_v45 = vadd.f32 %v1000_v50, %v3038_v22  ;;  %v3936_v38 = vld [vmem:[#allocation55_spill] sm:$0xff]  ;;  %2107 = vpow2.f32 %v1209_v40  ;;  %v2090_v35 = vpop.eup %2089  ;;  %v3942_v50 = vld [vmem:[#allocation57_spill] sm:$0xff] }
 0x2e4   : > { %v3937_v63 = vsub.f32 %v2868_v57, %v3936_v38  ;;  %v1213_v53 = vmul.f32 1.442695, %v1109_v48  ;;  %2109 = vrcp.f32 %v1293_v25  ;;  %v1294_v20 = vadd.f32 1.0, %v2088_v12  ;;  %v2092_v44 = vpop.eup %2091 }
 0x2e5   : > { %1605 = vst [vmem:[%s3294_s2 + $0xc0] sm:$0xff] %v1541_v39  ;;  %v1542_v28 = vadd.f32 %v1478_v27, %v3934_v31  ;;  %v1110_v43 = vsub.f32 0.0, %v1001_v45  ;;  %v1005_v19 = vadd.f32 %v1004_v8, %v3036_v29  ;;  %v3940_v26 = vsub.f32 %v3938_v36, %v3939_v49  ;;  %v3487_v31 = vld [vmem:[%s2729_s14 + $0x198] sm:$0xff] }
 0x2e6   : > { %v1479_v54 = vmul.f32 %v2086_v56, %v3937_v63  ;;  %2111 = vpow2.f32 %v1211_v21  ;;  %v1007_v16 = vadd.f32 %v1006_v58, %v3038_v22  ;;  %v2094_v40 = vpop.eup %2093  ;;  %v3943_v17 = vsub.f32 %v3941_v52, %v3942_v50  ;;  %v1012_v56 = vpop.f32.mrb[45].mxu1 }
 0x2e7   : > { %1606 = vst [vmem:[%s3294_s2 + $0xc8] sm:$0xff] %v1542_v28  ;;  %v1480_v57 = vmul.f32 %v2090_v35, %v3940_v26  ;;  %2113 = vrcp.f32 %v1294_v20  ;;  %v1215_v6 = vmul.f32 1.442695, %v1110_v43  ;;  %v1111_v47 = vsub.f32 0.0, %v1005_v19  ;;  %v2096_v39 = vpop.eup %2095  ;;  %v3944_v28 = vld [vmem:[#allocation26_spill] sm:$0xff]  ;;  %v3498_v20 = vld [vmem:[%s2721_s12 + $0x198] sm:$0xff] }
 0x2e8   : > { %v1543_v42 = vadd.f32 %v1479_v54, %v3936_v38  ;;  %v1481_v34 = vmul.f32 %v2092_v44, %v3943_v17  ;;  %v1295_v27 = vadd.f32 1.0, %v2094_v40  ;;  %2115 = vpow2.f32 %v1213_v53  ;;  %v2098_v25 = vpop.eup %2097  ;;  %v3945_v38 = vld [vmem:[#allocation56_spill] sm:$0xff]  ;;  %v1016_v36 = vpop.f32.mrb[46].mxu1 }
 0x2e9   : > { %v1544_v55 = vadd.f32 %v1480_v57, %v3939_v49  ;;  %v1112_v48 = vsub.f32 0.0, %v1007_v16  ;;  %v1296_v45 = vadd.f32 1.0, %v2096_v39  ;;  %2117 = vpow2.f32 %v1215_v6  ;;  %v2100_v12 = vpop.eup %2099  ;;  %v1018_v40 = vpop.f32.mrb[47].mxu1 }
 0x2ea   : > { %1607 = vst [vmem:[%s3294_s2 + $0xd0] sm:$0xff] %v1543_v42  ;;  %v1545_v21 = vadd.f32 %v1481_v34, %v3942_v50  ;;  %v1217_v8 = vmul.f32 1.442695, %v1111_v47  ;;  %v3946_v63 = vsub.f32 %v3944_v28, %v3945_v38  ;;  %2119 = vrcp.f32 %v1295_v27  ;;  %v2102_v53 = vpop.eup %2101 }
 0x2eb   : > { %1608 = vst [vmem:[%s3294_s2 + $0xd8] sm:$0xff] %v1544_v55  ;;  %v1219_v58 = vmul.f32 1.442695, %v1112_v48  ;;  %v1011_v35 = vadd.f32 %v1010_v30, %v3036_v29  ;;  %v1440_v43 = vsub.f32 %v3498_v20, %v3487_v31  ;;  %v3947_v19 = vsub.f32 %v2884_v61, %v3200_v23  ;;  %v2104_v49 = vpop.eup %2103 }
 0x2ec   : > { %v1482_v54 = vmul.f32 %v2098_v25, %v3946_v63  ;;  %1609 = vst [vmem:[%s3294_s2 + $0xe0] sm:$0xff] %v1545_v21  ;;  %2121 = vrcp.f32 %v1296_v45  ;;  %v1013_v42 = vadd.f32 %v1012_v56, %v3038_v22  ;;  %v1297_v57 = vadd.f32 1.0, %v2102_v53  ;;  %v2106_v52 = vpop.eup %2105  ;;  %v1022_v56 = vpop.f32.mrb[48].mxu1  ;;  %v3949_v45 = vld [vmem:[#allocation29_spill] sm:$0xff] }
 0x2ed   : > { %v1483_v44 = vmul.f32 %v2100_v12, %v3947_v19  ;;  %2123 = vpow2.f32 %v1217_v8  ;;  %v1113_v16 = vsub.f32 0.0, %v1011_v35  ;;  %v1298_v17 = vadd.f32 1.0, %v2104_v49  ;;  %v2108_v34 = vpop.eup %2107  ;;  %v3950_v8 = vld [vmem:[#allocation59_spill] sm:$0xff] }
 0x2ee   : > { %v1546_v26 = vadd.f32 %v1482_v54, %v3945_v38  ;;  %2125 = vpow2.f32 %v1219_v58  ;;  %v1114_v61 = vsub.f32 0.0, %v1013_v42  ;;  %v3948_v6 = vsub.f32 %v2879_v60, %v3193_v37  ;;  %v2110_v55 = vpop.eup %2109  ;;  %v1024_v38 = vpop.f32.mrb[49].mxu1 }
 0x2ef   : > { %v1547_v50 = vadd.f32 %v1483_v44, %v3200_v23  ;;  %2127 = vrcp.f32 %v1297_v57  ;;  %v1221_v30 = vmul.f32 1.442695, %v1113_v16  ;;  %v1017_v39 = vadd.f32 %v1016_v36, %v3036_v29  ;;  %v3952_v44 = vld [vmem:[#allocation28_spill] sm:$0xff] }
 0x2f0   : > { %1610 = vst [vmem:[%s3294_s2 + $0xe8] sm:$0xff] %v1546_v26  ;;  %v1484_v47 = vmul.f32 %v2106_v52, %v3948_v6  ;;  %2129 = vrcp.f32 %v1298_v17  ;;  %v1299_v27 = vadd.f32 1.0, %v2108_v34  ;;  %v1223_v48 = vmul.f32 1.442695, %v1114_v61  ;;  %v2112_v25 = vpop.eup %2111  ;;  %v1028_v52 = vpop.f32.mrb[50].mxu1 }
 0x2f1   : > { %1611 = vst [vmem:[%s3294_s2 + $0xf0] sm:$0xff] %v1547_v50  ;;  %v1019_v23 = vadd.f32 %v1018_v40, %v3038_v22  ;;  %v3951_v60 = vsub.f32 %v3949_v45, %v3950_v8  ;;  %2131 = vpow2.f32 %v1221_v30  ;;  %v1115_v28 = vsub.f32 0.0, %v1017_v39  ;;  %v2114_v63 = vpop.eup %2113  ;;  %v1030_v6 = vpop.f32.mrb[51].mxu1 }
 0x2f2   : > { %v1548_v21 = vadd.f32 %v1484_v47, %v3193_v37  ;;  %2133 = vrcp.f32 %v1299_v27  ;;  %v1300_v54 = vadd.f32 1.0, %v2112_v25  ;;  %v1023_v35 = vadd.f32 %v1022_v56, %v3036_v29  ;;  %v2116_v53 = vpop.eup %2115  ;;  %v3953_v37 = vld [vmem:[#allocation58_spill] sm:$0xff] }
 0x2f3   : > { %v1485_v12 = vmul.f32 %v2110_v55, %v3951_v60  ;;  %v1116_v58 = vsub.f32 0.0, %v1019_v23  ;;  %v3954_v42 = vsub.f32 %v3952_v44, %v3953_v37  ;;  %2135 = vpow2.f32 %v1223_v48  ;;  %v2118_v26 = vpop.eup %2117  ;;  %v3956_v23 = vld [vmem:[#allocation60_spill] sm:$0xff]  ;;  %v3959_v44 = vld [vmem:[#allocation62_spill] sm:$0xff] }
 0x2f4   : > { %1612 = vst [vmem:[%s3294_s2 + $0xf8] sm:$0xff] %v1548_v21  ;;  %v1225_v49 = vmul.f32 1.442695, %v1115_v28  ;;  %2137 = vrcp.f32 %v1300_v54  ;;  %v1301_v57 = vadd.f32 1.0, %v2116_v53  ;;  %v1117_v40 = vsub.f32 0.0, %v1023_v35  ;;  %v2120_v50 = vpop.eup %2119  ;;  %v1034_v28 = vpop.f32.mrb[52].mxu1 }
 0x2f5   : > { %v1549_v19 = vadd.f32 %v1485_v12, %v3950_v8  ;;  %v1486_v36 = vmul.f32 %v2114_v63, %v3954_v42  ;;  %v1227_v16 = vmul.f32 1.442695, %v1116_v58  ;;  %v1302_v61 = vadd.f32 1.0, %v2118_v26  ;;  %v2227_v63 = vld [vmem:[%s2729_s14 + $0x118] sm:$0xff]  ;;  %v1036_v35 = vpop.f32.mrb[53].mxu1  ;;  %v3961_v26 = vld [vmem:[#allocation30_spill] sm:$0xff] }
 0x2f6   : > { %2139 = vpow2.f32 %v1225_v49  ;;  %v1025_v34 = vadd.f32 %v1024_v38, %v3038_v22  ;;  %v2122_v47 = vpop.eup %2121  ;;  %v3955_v30 = vsub.f32 %v2900_v1, %v3224_v32  ;;  %v1229_v55 = vmul.f32 1.442695, %v1117_v40 }
 0x2f7   : > { %1613 = vst [vmem:[%s3294_s2 + $0x100] sm:$0xff] %v1549_v19  ;;  %v1550_v17 = vadd.f32 %v1486_v36, %v3953_v37  ;;  %2141 = vrcp.f32 %v1301_v57  ;;  %v1029_v27 = vadd.f32 %v1028_v52, %v3036_v29  ;;  %v2124_v48 = vpop.eup %2123  ;;  %v3957_v56 = vsub.f32 %v2895_v0, %v3956_v23  ;;  %v3958_v19 = vld [vmem:[#allocation31_spill] sm:$0xff]  ;;  %v3962_v57 = vld [vmem:[#allocation61_spill] sm:$0xff] }
 0x2f8   : > { %v1487_v39 = vmul.f32 %v2120_v50, %v3955_v30  ;;  %2143 = vrcp.f32 %v1302_v61  ;;  %v1118_v21 = vsub.f32 0.0, %v1025_v34  ;;  %v1031_v45 = vadd.f32 %v1030_v6, %v3038_v22  ;;  %v2126_v8 = vpop.eup %2125  ;;  %v2228_v61 = vld [vmem:[%s2729_s14 + $0x120] sm:$0xff]  ;;  %v1040_v30 = vpop.f32.mrb[54].mxu1 }
 0x2f9   : > { %1614 = vst [vmem:[%s3294_s2 + $0x108] sm:$0xff] %v1550_v17  ;;  %v1488_v25 = vmul.f32 %v2122_v47, %v3957_v56  ;;  %v1303_v60 = vadd.f32 1.0, %v2124_v48  ;;  %2145 = vpow2.f32 %v1227_v16  ;;  %v1119_v12 = vsub.f32 0.0, %v1029_v27  ;;  %v2128_v38 = vpop.eup %2127 }
 0x2fa   : > { %v1551_v1 = vadd.f32 %v1487_v39, %v3224_v32  ;;  %v1304_v58 = vadd.f32 1.0, %v2126_v8  ;;  %2147 = vpow2.f32 %v1229_v55  ;;  %v1231_v0 = vmul.f32 1.442695, %v1118_v21  ;;  %v2130_v53 = vpop.eup %2129  ;;  %v2229_v55 = vld [vmem:[%s2729_s14 + $0x128] sm:$0xff] }
 0x2fb   : > { %v1552_v54 = vadd.f32 %v2227_v63, %v1488_v25  ;;  %v3960_v37 = vsub.f32 %v3958_v19, %v3959_v44  ;;  %2149 = vrcp.f32 %v1303_v60  ;;  %v1233_v32 = vmul.f32 1.442695, %v1119_v12  ;;  %v2132_v49 = vpop.eup %2131  ;;  %v1042_v25 = vpop.f32.mrb[55].mxu1  ;;  %v2230_v12 = vld [vmem:[%s2729_s14 + $0x130] sm:$0xff]  ;;  %v2231_v19 = vld [vmem:[%s2729_s14 + $0x138] sm:$0xff] }
 0x2fc   : > { %1615 = vst [vmem:[%s3294_s2 + $0x110] sm:$0xff] %v1551_v1  ;;  %v1120_v36 = vsub.f32 0.0, %v1031_v45  ;;  %v3963_v16 = vsub.f32 %v3961_v26, %v3962_v57  ;;  %2151 = vrcp.f32 %v1304_v58  ;;  %v1035_v52 = vadd.f32 %v1034_v28, %v3036_v29  ;;  %v2134_v17 = vpop.eup %2133  ;;  %v3969_v26 = vld [vmem:[#allocation63_spill] sm:$0xff] }
 0x2fd   : > { %v1489_v42 = vmul.f32 %v2128_v38, %v3960_v37  ;;  %1616 = vst [vmem:[%s3294_s2 + $0x118] sm:$0xff] %v1552_v54  ;;  %v1037_v50 = vadd.f32 %v1036_v35, %v3038_v22  ;;  %v1305_v6 = vadd.f32 1.0, %v2132_v49  ;;  %2153 = vpow2.f32 %v1231_v0  ;;  %v2136_v39 = vpop.eup %2135  ;;  %v1046_v35 = vpop.f32.mrb[56].mxu1  ;;  %v3966_v37 = vld [vmem:[#allocation64_spill] sm:$0xff] }
 0x2fe   : > { %v1490_v40 = vmul.f32 %v2130_v53, %v3963_v16  ;;  %v1235_v47 = vmul.f32 1.442695, %v1120_v36  ;;  %v3964_v48 = vsub.f32 %v2916_v7, %v3246_v62  ;;  %2155 = vpow2.f32 %v1233_v32  ;;  %v2138_v21 = vpop.eup %2137  ;;  %v3968_v49 = vld [vmem:[#allocation32_spill] sm:$0xff] }
 0x2ff   : > { %v1553_v34 = vadd.f32 %v2228_v61, %v1489_v42  ;;  %v1121_v56 = vsub.f32 0.0, %v1035_v52  ;;  %2157 = vrcp.f32 %v1305_v6  ;;  %v1306_v45 = vadd.f32 1.0, %v2136_v39 }
 0x300   : > { %v1554_v27 = vadd.f32 %v2229_v55, %v1490_v40  ;;  %v1491_v23 = vmul.f32 %v2134_v17, %v3964_v48  ;;  %v1122_v8 = vsub.f32 0.0, %v1037_v50  ;;  %v1041_v1 = vadd.f32 %v1040_v30, %v3036_v29  ;;  %v2140_v60 = vpop.eup %2139  ;;  %v2232_v17 = vld [vmem:[%s2729_s14 + $0x140] sm:$0xff] }
 0x301   : > { %1617 = vst [vmem:[%s3294_s2 + $0x120] sm:$0xff] %v1553_v34  ;;  %v3965_v62 = vsub.f32 %v2911_v5, %v3241_v59  ;;  %2159 = vpow2.f32 %v1235_v47  ;;  %v1237_v38 = vmul.f32 1.442695, %v1121_v56  ;;  %v2142_v63 = vpop.eup %2141  ;;  %v1307_v54 = vadd.f32 1.0, %v2140_v60  ;;  %v1048_v59 = vpop.f32.mrb[57].mxu1  ;;  %v2233_v47 = vld [vmem:[%s2729_s14 + $0x148] sm:$0xff] }
 0x302   : > { %1618 = vst [vmem:[%s3294_s2 + $0x128] sm:$0xff] %v1554_v27  ;;  %v1555_v28 = vadd.f32 %v2230_v12, %v1491_v23  ;;  %2161 = vrcp.f32 %v1306_v45  ;;  %v1239_v58 = vmul.f32 1.442695, %v1122_v8  ;;  %v1123_v0 = vsub.f32 0.0, %v1041_v1  ;;  %v2144_v53 = vpop.eup %2143  ;;  %v1052_v27 = vpop.f32.mrb[58].mxu1  ;;  %v3971_v23 = vld [vmem:[#allocation34_spill] sm:$0xff] }
 0x303   : > { %v1492_v7 = vmul.f32 %v2138_v21, %v3965_v62  ;;  %v3967_v42 = vsub.f32 %v2924_v9, %v3966_v37  ;;  %2163 = vpow2.f32 %v1237_v38  ;;  %v1043_v5 = vadd.f32 %v1042_v25, %v3038_v22  ;;  %v2146_v36 = vpop.eup %2145  ;;  %v3972_v56 = vld [vmem:[#allocation66_spill] sm:$0xff]  ;;  %v1054_v1 = vpop.f32.mrb[59].mxu1  ;;  %v3974_v12 = vld [vmem:[#allocation33_spill] sm:$0xff] }
 0x304   : > { %1619 = vst [vmem:[%s3294_s2 + $0x130] sm:$0xff] %v1555_v28  ;;  %v3970_v57 = vsub.f32 %v3968_v49, %v3969_v26  ;;  %2165 = vrcp.f32 %v1307_v54  ;;  %v1241_v40 = vmul.f32 1.442695, %v1123_v0  ;;  %v1047_v52 = vadd.f32 %v1046_v35, %v3036_v29  ;;  %v2148_v50 = vpop.eup %2147  ;;  %v3975_v28 = vld [vmem:[#allocation65_spill] sm:$0xff] }
 0x305   : > { %v1556_v44 = vadd.f32 %v2231_v19, %v1492_v7  ;;  %v1493_v32 = vmul.f32 %v2142_v63, %v3967_v42  ;;  %v1308_v61 = vadd.f32 1.0, %v2146_v36  ;;  %2167 = vpow2.f32 %v1239_v58  ;;  %v2150_v6 = vpop.eup %2149  ;;  %v2234_v58 = vld [vmem:[%s2729_s14 + $0x150] sm:$0xff] }
 0x306   : > { %v1494_v16 = vmul.f32 %v2144_v53, %v3970_v57  ;;  %v1124_v34 = vsub.f32 0.0, %v1043_v5  ;;  %v1309_v39 = vadd.f32 1.0, %v2148_v50  ;;  %2169 = vpow2.f32 %v1241_v40  ;;  %v2152_v48 = vpop.eup %2151  ;;  %v1058_v5 = vpop.f32.mrb[60].mxu1 }
 0x307   : > { %1620 = vst [vmem:[%s3294_s2 + $0x138] sm:$0xff] %v1556_v44  ;;  %v1557_v9 = vadd.f32 %v2232_v17, %v1493_v32  ;;  %v1125_v55 = vsub.f32 0.0, %v1047_v52  ;;  %v3973_v25 = vsub.f32 %v3971_v23, %v3972_v56  ;;  %2171 = vrcp.f32 %v1308_v61  ;;  %v2154_v60 = vpop.eup %2153  ;;  %v2235_v44 = vld [vmem:[%s2729_s14 + $0x158] sm:$0xff]  ;;  %v2236_v61 = vld [vmem:[%s2729_s14 + $0x160] sm:$0xff] }
 0x308   : > { %v1558_v30 = vadd.f32 %v2233_v47, %v1494_v16  ;;  %v1243_v45 = vmul.f32 1.442695, %v1124_v34  ;;  %v1049_v8 = vadd.f32 %v1048_v59, %v3038_v22  ;;  %v3976_v62 = vsub.f32 %v3974_v12, %v3975_v28  ;;  %v2156_v54 = vpop.eup %2155  ;;  %v1060_v16 = vpop.f32.mrb[61].mxu1  ;;  %v458_v12 = vld [vmem:[%s2729_s14 + $0x190] sm:$0xff] }
 0x309   : > { %1621 = vst [vmem:[%s3294_s2 + $0x140] sm:$0xff] %v1557_v9  ;;  %v1495_v21 = vmul.f32 %v2150_v6, %v3973_v25  ;;  %2173 = vrcp.f32 %v1309_v39  ;;  %v1245_v38 = vmul.f32 1.442695, %v1125_v55  ;;  %v1053_v63 = vadd.f32 %v1052_v27, %v3036_v29  ;;  %v2158_v19 = vpop.eup %2157  ;;  %v3978_v6 = vld [vmem:[#allocation35_spill] sm:$0xff]  ;;  %v1064_v23 = vpop.f32.mrb[62].mxu1  ;;  %v2237_v25 = vld [vmem:[%s2729_s14 + $0x168] sm:$0xff] }
 0x30a   : > { %1622 = vst [vmem:[%s3294_s2 + $0x148] sm:$0xff] %v1558_v30  ;;  %v1496_v7 = vmul.f32 %v2152_v48, %v3976_v62  ;;  %v1310_v35 = vadd.f32 1.0, %v2154_v60  ;;  %2175 = vpow2.f32 %v1243_v45  ;;  %v1126_v53 = vsub.f32 0.0, %v1049_v8 }
 0x30b   : > { %v1559_v0 = vadd.f32 %v2234_v58, %v1495_v21  ;;  %v1311_v42 = vadd.f32 1.0, %v2156_v54  ;;  %2177 = vpow2.f32 %v1245_v38  ;;  %v1127_v32 = vsub.f32 0.0, %v1053_v63  ;;  %v2160_v59 = vpop.eup %2159 }
 0x30c   : > { %v1560_v37 = vadd.f32 %v2235_v44, %v1496_v7  ;;  %v3977_v36 = vsub.f32 %v3888_v51, %v3286_v11  ;;  %2179 = vrcp.f32 %v1310_v35  ;;  %v1247_v26 = vmul.f32 1.442695, %v1126_v53  ;;  %v2162_v40 = vpop.eup %2161  ;;  %v3979_v11 = vld [vmem:[#allocation67_spill] sm:$0xff] }
 0x30d   : > { %1623 = vst [vmem:[%s3294_s2 + $0x150] sm:$0xff] %v1559_v0  ;;  %v1055_v57 = vadd.f32 %v1054_v1, %v3038_v22  ;;  %2181 = vrcp.f32 %v1311_v42  ;;  %v1312_v52 = vadd.f32 1.0, %v2160_v59  ;;  %v1249_v50 = vmul.f32 1.442695, %v1127_v32  ;;  %v2164_v9 = vpop.eup %2163  ;;  %v1066_v1 = vpop.f32.mrb[63].mxu1  ;;  %v460_v42 = vld [vmem:[%s2729_s14 + $0x1a0] sm:$0xff] }
 0x30e   : > { %v1497_v49 = vmul.f32 %v2158_v19, %v3977_v36  ;;  %1624 = vst [vmem:[%s3294_s2 + $0x158] sm:$0xff] %v1560_v37  ;;  %v1059_v17 = vadd.f32 %v1058_v5, %v3036_v29  ;;  %v3980_v51 = vsub.f32 %v3978_v6, %v3979_v11  ;;  %2183 = vpow2.f32 %v1247_v26  ;;  %v2166_v39 = vpop.eup %2165  ;;  %v2238_v19 = vld [vmem:[%s2721_s12 + $0x190] sm:$0xff]  ;;  %v461_v36 = vld [vmem:[%s2729_s14 + $0x1a8] sm:$0xff] }
 0x30f   : > { %v1128_v30 = vsub.f32 0.0, %v1055_v57  ;;  %2185 = vrcp.f32 %v1312_v52  ;;  %v1313_v55 = vadd.f32 1.0, %v2164_v9  ;;  %v1061_v48 = vadd.f32 %v1060_v16, %v3038_v22  ;;  %v2168_v56 = vpop.eup %2167  ;;  %v2240_v16 = vld [vmem:[%s2721_s12 + $0x1a0] sm:$0xff]  ;;  %v462_v52 = vld [vmem:[%s2729_s14 + $0x1b0] sm:$0xff] }
 0x310   : > { %v1561_v34 = vadd.f32 %v2236_v61, %v1497_v49  ;;  %v1498_v47 = vmul.f32 %v2162_v40, %v3980_v51  ;;  %v1129_v27 = vsub.f32 0.0, %v1059_v17  ;;  %v1499_v45 = vmul.f32 %v2166_v39, %v1435_v13  ;;  %v2170_v60 = vpop.eup %2169  ;;  %v463_v51 = vld [vmem:[%s2729_s14 + $0x1b8] sm:$0xff] }
 0x311   : > { %2187 = vpow2.f32 %v1249_v50  ;;  %v1251_v8 = vmul.f32 1.442695, %v1128_v30  ;;  %v1314_v28 = vadd.f32 1.0, %v2168_v56  ;;  %v1130_v7 = vsub.f32 0.0, %v1061_v48  ;;  %v2172_v38 = vpop.eup %2171  ;;  %v2243_v56 = vld [vmem:[%s2721_s12 + $0x1b8] sm:$0xff] }
 0x312   : > { %1625 = vst [vmem:[%s3294_s2 + $0x160] sm:$0xff] %v1561_v34  ;;  %v1562_v21 = vadd.f32 %v2237_v25, %v1498_v47  ;;  %2189 = vrcp.f32 %v1313_v55  ;;  %v1253_v62 = vmul.f32 1.442695, %v1129_v27  ;;  %v1563_v63 = vadd.f32 %v1499_v45, %v3340_v46  ;;  %v2242_v47 = vld [vmem:[%s2721_s12 + $0x1b0] sm:$0xff]  ;;  %v464_v55 = vld [vmem:[%s2729_s14 + $0x1c0] sm:$0xff] }
 0x313   : > { %v1315_v54 = vadd.f32 1.0, %v2170_v60  ;;  %2191 = vpow2.f32 %v1251_v8  ;;  %v1065_v24 = vadd.f32 %v1064_v23, %v3036_v29  ;;  %v2174_v13 = vpop.eup %2173  ;;  %v1500_v58 = vmul.f32 %v2172_v38, %v1436_v4  ;;  %v2244_v60 = vld [vmem:[%s2721_s12 + $0x1c0] sm:$0xff] }
 0x314   : > { %1626 = vst [vmem:[%s3294_s2 + $0x168] sm:$0xff] %v1562_v21  ;;  %2193 = vrcp.f32 %v1314_v28  ;;  %v1255_v0 = vmul.f32 1.442695, %v1130_v7  ;;  %v1067_v35 = vadd.f32 %v1066_v1, %v3038_v22  ;;  %v2176_v53 = vpop.eup %2175  ;;  %v1439_v44 = vsub.f32 %v2238_v19, %v458_v12  ;;  %1627 = vst [vmem:[%s3294_s2 + $0x170] sm:$0xff] %v1563_v63  ;;  %v465_v1 = vld [vmem:[%s2729_s14 + $0x1c8] sm:$0xff]  ;;  %v466_v63 = vld [vmem:[%s2729_s14 + $0x1d0] sm:$0xff] }
 0x315   : > { %v1501_v46 = vmul.f32 %v2174_v13, %v1437_v14  ;;  %2195 = vrcp.f32 %v1315_v54  ;;  %v1131_v29 = vsub.f32 0.0, %v1065_v24  ;;  %v2178_v37 = vpop.eup %2177  ;;  %v1564_v18 = vadd.f32 %v2239_v3, %v1500_v58  ;;  %v2245_v58 = vld [vmem:[%s2721_s12 + $0x1c8] sm:$0xff]  ;;  %v467_v19 = vld [vmem:[%s2729_s14 + $0x1d8] sm:$0xff] }
 0x316   : > { %v1316_v4 = vadd.f32 1.0, %v2176_v53  ;;  %2197 = vpow2.f32 %v1253_v62  ;;  %v1132_v22 = vsub.f32 0.0, %v1067_v35  ;;  %v2180_v32 = vpop.eup %2179  ;;  %v1317_v59 = vadd.f32 1.0, %v2178_v37 }
 0x317   : > { %v1565_v5 = vadd.f32 %v1501_v46, %v3428_v41  ;;  %2199 = vpow2.f32 %v1255_v0  ;;  %v1257_v33 = vmul.f32 1.442695, %v1131_v29  ;;  %v2182_v14 = vpop.eup %2181  ;;  %1628 = vst [vmem:[%s3294_s2 + $0x178] sm:$0xff] %v1564_v18  ;;  %v1502_v49 = vmul.f32 %v2180_v32, %v1438_v10  ;;  %v2241_v10 = vld [vmem:[%s2721_s12 + $0x1a8] sm:$0xff]  ;;  %v2246_v29 = vld [vmem:[%s2721_s12 + $0x1d0] sm:$0xff]  ;;  %v2247_v32 = vld [vmem:[%s2721_s12 + $0x1d8] sm:$0xff] }
 0x318   : > { %2201 = vrcp.f32 %v1316_v4  ;;  %v1259_v26 = vmul.f32 1.442695, %v1132_v22  ;;  %v2184_v57 = vpop.eup %2183  ;;  %v1441_v40 = vsub.f32 %v2240_v16, %v460_v42  ;;  %v1503_v41 = vmul.f32 %v2182_v14, %v1439_v44  ;;  %v2248_v16 = vld [vmem:[%s2721_s12 + $0x1e0] sm:$0xff] }
 0x319   : > { %1629 = vst [vmem:[%s3294_s2 + $0x180] sm:$0xff] %v1565_v5  ;;  %2203 = vrcp.f32 %v1317_v59  ;;  %v2186_v50 = vpop.eup %2185  ;;  %v1566_v17 = vadd.f32 %v1502_v49, %v3377_v15  ;;  %v1318_v9 = vadd.f32 1.0, %v2184_v57  ;;  %v1442_v61 = vsub.f32 %v2241_v10, %v461_v36  ;;  %v468_v59 = vld [vmem:[%s2729_s14 + $0x1e0] sm:$0xff] }
 0x31a   : > { %2205 = vpow2.f32 %v1257_v33  ;;  %v1567_v34 = vadd.f32 %v1503_v41, %v458_v12  ;;  %v1504_v6 = vmul.f32 %v2186_v50, %v1440_v43  ;;  %v1443_v30 = vsub.f32 %v2242_v47, %v462_v52  ;;  %v470_v50 = vld [vmem:[%s2729_s14 + $0x1f0] sm:$0xff]  ;;  %v2251_v47 = vld [vmem:[%s2721_s12 + $0x1f8] sm:$0xff] }
 0x31b   : > { %v2188_v2 = vpop.eup %2187  ;;  %2207 = vpow2.f32 %v1259_v26  ;;  %1630 = vst [vmem:[%s3294_s2 + $0x188] sm:$0xff] %v1566_v17  ;;  %v1444_v25 = vsub.f32 %v2243_v56, %v463_v51  ;;  %v1445_v12 = vsub.f32 %v2244_v60, %v464_v55  ;;  %v1446_v0 = vsub.f32 %v2245_v58, %v465_v1 }
 0x31c   : > { %v2190_v11 = vpop.eup %2189  ;;  %2209 = vrcp.f32 %v1318_v9  ;;  %v1319_v15 = vadd.f32 1.0, %v2188_v2  ;;  %1631 = vst [vmem:[%s3294_s2 + $0x190] sm:$0xff] %v1567_v34  ;;  %v1568_v27 = vadd.f32 %v1504_v6, %v3487_v31  ;;  %v1447_v37 = vsub.f32 %v2246_v29, %v466_v63  ;;  %v471_v2 = vld [vmem:[%s2729_s14 + $0x1f8] sm:$0xff]  ;;  %v2250_v6 = vld [vmem:[%s2721_s12 + $0x1f0] sm:$0xff] }
 0x31d   : > { %v2192_v39 = vpop.eup %2191  ;;  %v1505_v48 = vmul.f32 %v2190_v11, %v1441_v40  ;;  %v1448_v5 = vsub.f32 %v2247_v32, %v467_v19  ;;  %v1449_v40 = vsub.f32 %v2248_v16, %v468_v59  ;;  %v1451_v11 = vsub.f32 %v2250_v6, %v470_v50 }
 0x31e   : > { %v2194_v20 = vpop.eup %2193  ;;  %2211 = vrcp.f32 %v1319_v15  ;;  %v1320_v43 = vadd.f32 1.0, %v2192_v39  ;;  %1632 = vst [vmem:[%s3294_s2 + $0x198] sm:$0xff] %v1568_v27 }
 0x31f   : > { %v2196_v23 = vpop.eup %2195  ;;  %v1569_v21 = vadd.f32 %v1505_v48, %v460_v42  ;;  %v1506_v45 = vmul.f32 %v2194_v20, %v1442_v61 }
 0x320   : > { %v2198_v8 = vpop.eup %2197  ;;  %v1507_v28 = vmul.f32 %v2196_v23, %v1443_v30  ;;  %2213 = vrcp.f32 %v1320_v43  ;;  %v1452_v30 = vsub.f32 %v2251_v47, %v471_v2 }
 0x321   : > { %v2200_v31 = vpop.eup %2199  ;;  %1633 = vst [vmem:[%s3294_s2 + $0x1a0] sm:$0xff] %v1569_v21  ;;  %v1570_v62 = vadd.f32 %v1506_v45, %v461_v36  ;;  %v1321_v7 = vadd.f32 1.0, %v2198_v8  ;;  %v469_v36 = vld [vmem:[%s2729_s14 + $0x1e8] sm:$0xff] }
 0x322   : > { %v2202_v38 = vpop.eup %2201  ;;  %v1571_v54 = vadd.f32 %v1507_v28, %v462_v52  ;;  %v1322_v24 = vadd.f32 1.0, %v2200_v31  ;;  %v2249_v52 = vld [vmem:[%s2721_s12 + $0x1e8] sm:$0xff]  ;;  %s2374_s12 = scalar_lea.vmem %s2373_s20, 16384 }
 0x323   : > { %v2204_v13 = vpop.eup %2203  ;;  %1634 = vst [vmem:[%s3294_s2 + $0x1a8] sm:$0xff] %v1570_v62  ;;  %v1508_v35 = vmul.f32 %v2202_v38, %v1444_v25  ;;  %2215 = vrcp.f32 %v1321_v7  ;;  %v1450_v41 = vsub.f32 %v2249_v52, %v469_v36  ;;  %p2376_p7 = scmp.lt.s32.totalorder %s2374_s12, %s2368_s0 }
 0x324   : > { %v2206_v53 = vpop.eup %2205  ;;  %1635 = vst [vmem:[%s3294_s2 + $0x1b0] sm:$0xff] %v1571_v54  ;;  %v1509_v44 = vmul.f32 %v2204_v13, %v1445_v12  ;;  %2217 = vrcp.f32 %v1322_v24 }
 0x325   : > { %v2208_v46 = vpop.eup %2207  ;;  %v1572_v42 = vadd.f32 %v1508_v35, %v463_v51  ;;  %v1323_v3 = vadd.f32 1.0, %v2206_v53  ;;  %p2377_p3 = por %p2376_p7, %p2375_p4 }
 0x326   : > { %v2210_v18 = vpop.eup %2209  ;;  %v1573_v4 = vadd.f32 %v1509_v44, %v464_v55  ;;  %v1324_v22 = vadd.f32 1.0, %v2208_v46 }
 0x327   : > { %1636 = vst [vmem:[%s3294_s2 + $0x1b8] sm:$0xff] %v1572_v42  ;;  %v1510_v33 = vmul.f32 %v2210_v18, %v1446_v0  ;;  %2219 = vrcp.f32 %v1323_v3  ;;  %p2378_p5 = pnand %p2377_p3, %p2371_p10 }
 0x328   : > { %v2212_v14 = vpop.eup %2211  ;;  %1637 = vst [vmem:[%s3294_s2 + $0x1c0] sm:$0xff] %v1573_v4  ;;  %2221 = vrcp.f32 %v1324_v22 }
 0x329   : > { %v1574_v49 = vadd.f32 %v1510_v33, %v465_v1  ;;  %v1511_v26 = vmul.f32 %v2212_v14, %v1447_v37 }
 0x32a   : > { %v2214_v57 = vpop.eup %2213 }
 0x32b   : > { %1638 = vst [vmem:[%s3294_s2 + $0x1c8] sm:$0xff] %v1574_v49  ;;  %v1575_v17 = vadd.f32 %v1511_v26, %v466_v63  ;;  %v1512_v9 = vmul.f32 %v2214_v57, %v1448_v5 }
 0x32d   : > { %v2216_v10 = vpop.eup %2215  ;;  %1639 = vst [vmem:[%s3294_s2 + $0x1d0] sm:$0xff] %v1575_v17  ;;  %v1576_v61 = vadd.f32 %v1512_v9, %v467_v19 }
 0x32e   : > { %v2218_v34 = vpop.eup %2217  ;;  %v1513_v51 = vmul.f32 %v2216_v10, %v1449_v40 }
 0x32f   : > { %1640 = vst [vmem:[%s3294_s2 + $0x1d8] sm:$0xff] %v1576_v61  ;;  %v1514_v15 = vmul.f32 %v2218_v34, %v1450_v41 }
 0x330   : > { %v1577_v39 = vadd.f32 %v1513_v51, %v468_v59 }
 0x331   : > { %v2220_v55 = vpop.eup %2219  ;;  %v1578_v27 = vadd.f32 %v1514_v15, %v469_v36 }
 0x332   : > { %v2222_v48 = vpop.eup %2221  ;;  %1641 = vst [vmem:[%s3294_s2 + $0x1e0] sm:$0xff] %v1577_v39  ;;  %v1515_v20 = vmul.f32 %v2220_v55, %v1451_v11 }
 0x333   : > { %1642 = vst [vmem:[%s3294_s2 + $0x1e8] sm:$0xff] %v1578_v27  ;;  %v1516_v43 = vmul.f32 %v2222_v48, %v1452_v30 }
 0x334   : > { %v1579_v23 = vadd.f32 %v1515_v20, %v470_v50 }
 0x335   : > { %v1580_v56 = vadd.f32 %v1516_v43, %v471_v2 }
 0x336   : > { %1643 = vst [vmem:[%s3294_s2 + $0x1f0] sm:$0xff] %v1579_v23 }
 0x337   : > { %1644 = vst [vmem:[%s3294_s2 + $0x1f8] sm:$0xff] %v1580_v56 }
 0x338   : > { %2381 = shalt.err (!%p2378_p5)
}
 0x339   : > { %s2382_s29 = scalar_lea.hbm %s3671_s19, 8192  ;;  %s2386_s27 = scalar_lea.hbm %s3725_s6, 16384 }
 0x33a   : > { %p2383_p9 = scmp.ne.s32.totalorder %s3671_s19, %s2382_s29  ;;  %p2387_p11 = scmp.lt.u32.totalorder %s3671_s19, %s3725_s6 }
 0x33b   : > { %p2388_p1 = scmp.lt.u32.totalorder %s2386_s27, %s2382_s29  ;;  %p2390_p2 = scmp.lt.u32.totalorder %s2382_s29, %s3671_s19 }
 0x33c   : > { %p2384_p0 = pnand %p2383_p9, %p3981_p13 }
 0x33d   : > { %p2389_p12 = por %p2388_p1, %p2387_p11 }
 0x33e   : > { %p2385_p8 = pneg %p2384_p0 }
 0x33f   : > { %p2391_p6 = por %p2390_p2, %p2389_p12 }
 0x341   : > { %p2392_p10 = pnand %p2391_p6, %p2385_p8 }
 0x343   : > { %2395 = shalt.err (!%p2392_p10)
}
 0x344   : > { %s2459_s9 = smov 256   ;;  %s2460_s2 = smov 16  }
 0x345   : > { %1899 = dma.vmem_to_hbm [thread:$0]  (%p3981_p13), %s3673_s13, 8192, %s3671_s19, %s1646_s25, %s2459_s9, %s2459_s9, %s2460_s2  }
 0x346 PF: > { %s1675_s4 = sand.u32 1, %s2434_s21   ;;  %p3982_p4 = scmp.ne.s32.totalorder %s3814_s28, 0 }
 0x347   : > { %p3983_p7 = scmp.ge.s32.totalorder %s2446_s24, 2  ;;  %s1676_s18 = scalar_lea.sflag [#allocation4], %s1675_s4 }
 0x349   : > { %p1916_p3 = pnand %p3983_p7, %p3982_p4 }
 0x34b   : > { %2429 = dma.done.wait (!%p1916_p3), %s1676_s18, 8192  }
 0x34c   : > { %2431 = vsyncadd (!%p1916_p3), %s1676_s18, 4294959104  ;;  %p23_p5 = scmp.ge.s32.totalorder %s2609_s26, 4   ;;  %s3984_s21 = smov %s2438_s22 }
 0x34d   : > { %s3985_s22 = smov %s2442_s23  ;;  %s3986_s23 = smov %s2618_s11 }
 0x34e   : > { %s3987_s24 = smov %s2609_s26  ;;  %25 = sbr.rel (!%p23_p5) target bundleno = 12 (0xc), region = 110 }
 0x355   :  { %1681 = vsyncpa [#allocation3], 1 }
 0x356   :  { %1683 = vsyncpa [#allocation3 + $0x1], 1 }
 0x357   :  { %1684 = vsyncpa [#allocation6], 1 }
 0x358   :  { %1686 = vsyncpa [#allocation6 + $0x1], 1 }
 0x359   :  { %1687 = vsyncpa [#allocation9], 1 }
 0x35a   :  { %1688 = vsyncpa [#allocation4], 1 }
 0x35b   :  { %1690 = vsyncpa [#allocation4 + $0x1], 1 }

</bundles_post_ra>
